<compile_context>
chip_gen: v6e
topology: v6e:2x2x1
jax: 0.10.0
libtpu: 0.0.40
codegen_flags: <defaults>
</compile_context>

<pallas_src>
import functools
import math

import jax
import jax.numpy as jnp
from jax import lax
from jax.experimental import pallas as pl
from jax.experimental.pallas import tpu as pltpu


def _gelu_exact(x):
    # matches torch.nn.GELU() (erf formulation)
    return 0.5 * x * (1.0 + lax.erf(x * (1.0 / math.sqrt(2.0))))


def _shift_cols_right(p, zcol):
    """out[:, j] = p[:, j-1]; out[:, 0] = 0  (zero padding column)."""
    w = p.shape[1]
    if w == 1:
        return zcol
    return jnp.concatenate([zcol, p[:, :w - 1, :]], axis=1)


def _shift_cols_left(p, zcol):
    """out[:, j] = p[:, j+1]; out[:, -1] = 0  (zero padding column)."""
    w = p.shape[1]
    if w == 1:
        return zcol
    return jnp.concatenate([p[:, 1:, :], zcol], axis=1)


# ----------------------------------------------------------------------------
# Fused kernel, stride-2 depthwise path
# ----------------------------------------------------------------------------
def _fused_s2_kernel(xe_ref, xo_ref, xt_ref, w1_ref, b1_ref, w2_ref, b2_ref,
                     w3_ref, b3_ref, o_ref, y_sc, *, tho, C):
    """conv1(1x1)+GELU -> dw3x3(stride 2)+GELU -> conv3(1x1) for one
    (batch, tho output rows) tile.  Inputs are column-packed: channel halves of
    the last axis are the even / odd input columns of one output position."""
    i = pl.program_id(1)
    f32 = jnp.float32
    wo = xe_ref.shape[1]
    d2 = xe_ref.shape[2]
    c2 = 2 * C

    w1 = w1_ref[...]                   # (2*dim, 2*C) block-diagonal, BN scale folded
    b1 = b1_ref[...]                   # (1, 2*C)

    def conv1(v2d):                    # (n, 2*dim) -> (n, 2*C), stays column-packed
        return _gelu_exact(jnp.dot(v2d, w1, preferred_element_type=f32) + b1)

    # conv1 on the tile body (even / odd input rows arrive as separate DMA streams).
    ev = conv1(xe_ref[...].astype(f32).reshape(tho * wo, d2)).reshape(tho, wo, c2)
    od = conv1(xo_ref[...].astype(f32).reshape(tho * wo, d2)).reshape(tho, wo, c2)

    # conv1 on the single halo row above the tile (input row 2*i*tho - 1), recomputed
    # here instead of read from an HBM intermediate.  Image row -1 is conv2's zero
    # padding, i.e. the *conv1 output* of that row is zero.
    yt = conv1(xt_ref[...].astype(f32))                      # (wo, 2*C)
    yt = jnp.where(i == 0, 0.0, yt)

    # Stage [halo ; odd rows] so the dy=0 plane (input rows 2*oy - 1) is a plain
    # shifted window read (no row-wise concatenate / deinterleave copies).
    y_sc[0] = yt
    y_sc[pl.ds(1, tho)] = od
    r0 = y_sc[pl.ds(0, tho)]                                 # rows 2*oy - 1

    w2 = w2_ref[...].astype(f32)                             # (9, C), BN folded
    zcol = jnp.zeros((tho, 1, C), f32)
    acc = jnp.zeros((tho, wo, C), f32)
    for dy, p in enumerate((r0, ev, od)):                    # rows 2oy-1, 2oy, 2oy+1
        pe = p[..., :C]                                      # input col 2*ox
        po = p[..., C:]                                      # input col 2*ox + 1
        pm = _shift_cols_right(po, zcol)                     # input col 2*ox - 1
        acc = acc + pm * w2[3 * dy + 0] + pe * w2[3 * dy + 1] + po * w2[3 * dy + 2]

    # depthwise bias + GELU, then conv3 (1x1) on the MXU while the tile is in VMEM.
    h = _gelu_exact(acc + b2_ref[...])
    y = jnp.dot(h.reshape(tho * wo, C), w3_ref[...], preferred_element_type=f32)
    o_ref[...] = (y + b3_ref[...]).astype(o_ref.dtype)


# ----------------------------------------------------------------------------
# Fused kernel, stride-1 depthwise path (out_dim in {320, 448, 576})
# ----------------------------------------------------------------------------
def _fused_s1_kernel(xb_ref, xt_ref, xn_ref, w1_ref, b1_ref, w2_ref, b2_ref,
                     w3_ref, b3_ref, o_ref, y_sc, *, tho, C):
    i = pl.program_id(1)
    f32 = jnp.float32
    w = xb_ref.shape[1]
    din = xb_ref.shape[2]

    w1 = w1_ref[...]
    b1 = b1_ref[...]

    def conv1(v2d):
        return _gelu_exact(jnp.dot(v2d, w1, preferred_element_type=f32) + b1)

    yb = conv1(xb_ref[...].astype(f32).reshape(tho * w, din)).reshape(tho, w, C)
    yt = jnp.where(i == 0, 0.0, conv1(xt_ref[...].astype(f32)))
    yn = jnp.where(i == pl.num_programs(1) - 1, 0.0, conv1(xn_ref[...].astype(f32)))

    # Stage [top halo ; body ; bottom halo]; the three dy planes become shifted reads.
    y_sc[0] = yt
    y_sc[pl.ds(1, tho)] = yb
    y_sc[tho + 1] = yn

    w2 = w2_ref[...].astype(f32)
    zcol = jnp.zeros((tho, 1, C), f32)
    acc = jnp.zeros((tho, w, C), f32)
    for dy in range(3):
        rows = y_sc[pl.ds(dy, tho)]                          # input rows oy - 1 + dy
        left = _shift_cols_right(rows, zcol)                 # input col ox - 1
        right = _shift_cols_left(rows, zcol)                 # input col ox + 1
        acc = (acc + left * w2[3 * dy + 0] + rows * w2[3 * dy + 1]
               + right * w2[3 * dy + 2])

    h = _gelu_exact(acc + b2_ref[...])
    y = jnp.dot(h.reshape(tho * w, C), w3_ref[...], preferred_element_type=f32)
    o_ref[...] = (y + b3_ref[...]).astype(o_ref.dtype)


# ----------------------------------------------------------------------------
# Wrappers
# ----------------------------------------------------------------------------
def _pick_tho(Ho, Wo, bytes_per_out_row, vmem_budget):
    """Largest divisor d of Ho with (d*Wo) % 8 == 0 (sublane-aligned output block)
    that fits the per-tile VMEM budget.  Never silently falls back to the whole
    image unless that is the only layout-legal choice."""
    cap = max(1, vmem_budget // max(1, bytes_per_out_row))
    best = None
    for d in range(1, Ho + 1):
        if Ho % d == 0 and (d * Wo) % 8 == 0 and d <= cap:
            best = d
    if best is not None:
        return best
    for d in range(1, Ho + 1):            # smallest aligned divisor (over budget)
        if Ho % d == 0 and (d * Wo) % 8 == 0:
            return d
    return Ho                              # full-array block is always layout-legal


def fused_patch_merging_s2(x5, w1blk, b1blk, w2, b2, w3, b3, *, Ho, Wo, C, dim,
                           vmem_budget=12 << 20):
    """x5: (B, Ho, 2, Wo, 2*dim) row-pair / column packed input (free reshape of
    NHWC).  Returns (B, Ho*Wo, C)."""
    B = x5.shape[0]
    d2 = 2 * dim
    c2 = 2 * C
    itm = x5.dtype.itemsize
    per_row = (2 * 2 * Wo * d2 * itm        # even + odd input streams, double-buffered
               + Wo * c2 * 4                # [halo ; odd rows] staging scratch
               + 12 * Wo * C * 4            # conv1 outputs / planes / acc temporaries
               + 2 * Wo * C * itm)          # output block, double-buffered
    tho = _pick_tho(Ho, Wo, per_row, vmem_budget)
    n_tiles = Ho // tho

    kern = functools.partial(_fused_s2_kernel, tho=tho, C=C)

    ev_map = lambda b, i: (b, i, 0, 0, 0)                             # even input rows
    od_map = lambda b, i: (b, i, 1, 0, 0)                             # odd input rows
    top_map = lambda b, i: (b, jnp.maximum(i * tho - 1, 0), 1, 0, 0)  # row 2*i*tho - 1

    return pl.pallas_call(
        kern,
        out_shape=jax.ShapeDtypeStruct((B, Ho * Wo, C), x5.dtype),
        grid_spec=pltpu.PrefetchScalarGridSpec(
            num_scalar_prefetch=0,
            grid=(B, n_tiles),
            in_specs=[
                pl.BlockSpec((None, tho, None, Wo, d2), ev_map),
                pl.BlockSpec((None, tho, None, Wo, d2), od_map),
                pl.BlockSpec((None, None, None, Wo, d2), top_map),   # top halo row
                pl.BlockSpec((d2, c2), lambda b, i: (0, 0)),          # conv1 block-diag
                pl.BlockSpec((1, c2), lambda b, i: (0, 0)),
                pl.BlockSpec((9, C), lambda b, i: (0, 0)),            # depthwise taps
                pl.BlockSpec((1, C), lambda b, i: (0, 0)),
                pl.BlockSpec((C, C), lambda b, i: (0, 0)),            # conv3
                pl.BlockSpec((1, C), lambda b, i: (0, 0)),
            ],
            out_specs=pl.BlockSpec((None, tho * Wo, C), lambda b, i: (b, i, 0)),
            scratch_shapes=[pltpu.VMEM((tho + 1, Wo, c2), jnp.float32)],
        ),
        compiler_params=pltpu.CompilerParams(
            dimension_semantics=("parallel", "parallel"),
            vmem_limit_bytes=32 * 1024 * 1024),
    )(x5, x5, x5, w1blk, b1blk, w2, b2, w3, b3)


def fused_patch_merging_s1(x, w1, b1, w2, b2, w3, b3, *, H, W, C, dim,
                           vmem_budget=12 << 20):
    """x: (B, H, W, dim) NHWC.  Returns (B, H*W, C)."""
    B = x.shape[0]
    itm = x.dtype.itemsize
    per_row = (2 * W * dim * itm            # input rows, double-buffered
               + W * C * 4                  # staging scratch
               + 10 * W * C * 4             # in-kernel f32 temporaries
               + 2 * W * C * itm)           # output block, double-buffered
    tho = _pick_tho(H, W, per_row, vmem_budget)
    n_tiles = H // tho

    kern = functools.partial(_fused_s1_kernel, tho=tho, C=C)

    body_map = lambda b, i: (b, i, 0, 0)
    top_map = lambda b, i: (b, jnp.maximum(i * tho - 1, 0), 0, 0)
    bot_map = lambda b, i: (b, jnp.minimum((i + 1) * tho, H - 1), 0, 0)

    return pl.pallas_call(
        kern,
        out_shape=jax.ShapeDtypeStruct((B, H * W, C), x.dtype),
        grid_spec=pltpu.PrefetchScalarGridSpec(
            num_scalar_prefetch=0,
            grid=(B, n_tiles),
            in_specs=[
                pl.BlockSpec((None, tho, W, dim), body_map),
                pl.BlockSpec((None, None, W, dim), top_map),
                pl.BlockSpec((None, None, W, dim), bot_map),
                pl.BlockSpec((dim, C), lambda b, i: (0, 0)),
                pl.BlockSpec((1, C), lambda b, i: (0, 0)),
                pl.BlockSpec((9, C), lambda b, i: (0, 0)),
                pl.BlockSpec((1, C), lambda b, i: (0, 0)),
                pl.BlockSpec((C, C), lambda b, i: (0, 0)),
                pl.BlockSpec((1, C), lambda b, i: (0, 0)),
            ],
            out_specs=pl.BlockSpec((None, tho * W, C), lambda b, i: (b, i, 0)),
            scratch_shapes=[pltpu.VMEM((tho + 2, W, C), jnp.float32)],
        ),
        compiler_params=pltpu.CompilerParams(
            dimension_semantics=("parallel", "parallel"),
            vmem_limit_bytes=32 * 1024 * 1024),
    )(x, x, x, w1, b1, w2, b2, w3, b3)


# ----------------------------------------------------------------------------
# Module
# ----------------------------------------------------------------------------
def _fold_bn(gamma, beta, mean, var, eps=1e-5):
    scale = gamma / jnp.sqrt(var + eps)
    bias = beta - mean * scale
    return scale, bias


class PatchMergingPallas:
    """Pallas forward for TinyViT / MobileSAM PatchMerging (eval mode)."""

    def __init__(self, input_resolution, dim, out_dim, key):
        self.input_resolution = input_resolution
        self.dim = dim
        self.out_dim = out_dim
        self.stride_c = 1 if out_dim in (320, 448, 576) else 2

        k1, k2, k3 = jax.random.split(key, 3)
        lim1 = 1.0 / math.sqrt(dim)
        w1 = jax.random.uniform(k1, (dim, out_dim), jnp.float32, -lim1, lim1)
        lim2 = 1.0 / math.sqrt(9.0)             # depthwise: in_ch / groups == 1
        w2 = jax.random.uniform(k2, (3, 3, out_dim), jnp.float32, -lim2, lim2)
        lim3 = 1.0 / math.sqrt(out_dim)
        w3 = jax.random.uniform(k3, (out_dim, out_dim), jnp.float32, -lim3, lim3)

        # One BatchNorm2d per Conv2d_BN (default init, eval-mode running stats).
        def default_bn():
            return (jnp.ones((out_dim,), jnp.float32),
                    jnp.zeros((out_dim,), jnp.float32),
                    jnp.zeros((out_dim,), jnp.float32),
                    jnp.ones((out_dim,), jnp.float32))

        s1, bias1 = _fold_bn(*default_bn())
        s2, bias2 = _fold_bn(*default_bn())
        s3, bias3 = _fold_bn(*default_bn())

        # Fold the per-channel BN scale into the conv weights; keep the bias.
        self.w1f = w1 * s1[None, :]
        self.b1 = bias1.reshape(1, out_dim)
        self.w2f = (w2 * s2[None, None, :]).reshape(9, out_dim)      # (3*dy + dx, C)
        self.b2 = bias2.reshape(1, out_dim)
        self.w3f = w3 * s3[None, :]
        self.b3 = bias3.reshape(1, out_dim)

        if self.stride_c == 2:
            # Block-diagonal conv1 weight: the column-packed (.., 2*dim) tile goes
            # through the MXU in one shot and comes out column-packed (.., 2*C).
            z = jnp.zeros((dim, out_dim), jnp.float32)
            self.w1blk = jnp.concatenate([
                jnp.concatenate([self.w1f, z], axis=1),
                jnp.concatenate([z, self.w1f], axis=1)], axis=0)       # (2*dim, 2*C)
            self.b1blk = jnp.concatenate([self.b1, self.b1], axis=1)   # (1, 2*C)

    def __call__(self, x):
        H, W = self.input_resolution
        if x.ndim == 3:                                  # (B, H*W, dim) -> NHWC
            B = x.shape[0]
            x = x.reshape(B, H, W, self.dim)
        else:                                            # NCHW (torch layout) -> NHWC
            x = jnp.transpose(x, (0, 2, 3, 1))
        B = x.shape[0]
        C = self.out_dim

        if self.stride_c == 2:
            assert H % 2 == 0 and W % 2 == 0, "stride-2 path expects even H, W"
            Ho, Wo = H // 2, W // 2
            # Free, contiguous reshape: row-parity axis + columns packed as channels.
            x5 = x.reshape(B, Ho, 2, Wo, 2 * self.dim)
            return fused_patch_merging_s2(x5, self.w1blk, self.b1blk, self.w2f,
                                          self.b2, self.w3f, self.b3,
                                          Ho=Ho, Wo=Wo, C=C, dim=self.dim)
        return fused_patch_merging_s1(x, self.w1f, self.b1, self.w2f, self.b2,
                                      self.w3f, self.b3,
                                      H=H, W=W, C=C, dim=self.dim)


# ----------------------------------------------------------------------------
# Pure-JAX reference (for validation)
# ----------------------------------------------------------------------------
def _reference_forward(module, x):
    H, W = module.input_resolution
    B = x.shape[0]
    hi = lax.Precision.HIGHEST
    xi = x.reshape(B, H, W, module.dim).astype(jnp.float32)
    y = _gelu_exact(jnp.einsum('bhwc,cd->bhwd', xi, module.w1f, precision=hi)
                    + module.b1[0])

    s = module.stride_c
    C = module.out_dim
    Ho = (H - 1) // s + 1
    Wo = (W - 1) // s + 1
    yp = jnp.pad(y, ((0, 0), (1, 1), (1, 1), (0, 0)))
    w2 = module.w2f.reshape(3, 3, C)
    acc = jnp.zeros((B, Ho, Wo, C), jnp.float32)
    for dy in range(3):
        for dx in range(3):
            acc = acc + yp[:, dy:dy + s * (Ho - 1) + 1:s,
                           dx:dx + s * (Wo - 1) + 1:s, :] * w2[dy, dx]
    z = _gelu_exact(acc + module.b2[0])
    out = jnp.einsum('bhwc,cd->bhwd', z, module.w3f, precision=hi) + module.b3[0]
    return out.reshape(B, Ho * Wo, C)


if __name__ == "__main__":
    key = jax.random.PRNGKey(0)
    kx1, kp1, kx2, kp2 = jax.random.split(key, 4)

    # stride-2 path (out_dim not in {320, 448, 576})
    B, H, W, dim, out_dim = 2, 16, 16, 32, 64
    x = jax.random.normal(kx1, (B, H * W, dim), jnp.float32)          # (2, 256, 32)
    mod = PatchMergingPallas((H, W), dim, out_dim, kp1)
    out = jax.block_until_ready(mod(x))
    Ho, Wo = H // 2, W // 2
    assert out.shape == (B, Ho * Wo, out_dim), out.shape
    assert bool(jnp.all(jnp.isfinite(out)))
    err = float(jnp.max(jnp.abs(out - _reference_forward(mod, x))))
    assert err < 1e-2, f"stride-2 mismatch vs reference: max abs err = {err}"

    # stride-1 path (out_dim == 320)
    B1, H1, W1, dim1, out_dim1 = 1, 8, 8, 32, 320
    x1 = jax.random.normal(kx2, (B1, H1 * W1, dim1), jnp.float32)     # (1, 64, 32)
    mod1 = PatchMergingPallas((H1, W1), dim1, out_dim1, kp2)
    out1 = jax.block_until_ready(mod1(x1))
    assert out1.shape == (B1, H1 * W1, out_dim1), out1.shape
    assert bool(jnp.all(jnp.isfinite(out1)))
    err1 = float(jnp.max(jnp.abs(out1 - _reference_forward(mod1, x1))))
    assert err1 < 1e-2, f"stride-1 mismatch vs reference: max abs err = {err1}"

    print("KERNEL_OK")
</pallas_src>

<mosaic_0001>
module attributes {stable_mosaic.version = 11 : i64} {
  func.func @_fused_s2_kernel(%arg0: i32, %arg1: i32, %arg2: memref<1x8x1x8x64xf32, #tpu.memory_space<vmem>>, %arg3: memref<1x8x1x8x64xf32, #tpu.memory_space<vmem>>, %arg4: memref<1x1x1x8x64xf32, #tpu.memory_space<vmem>>, %arg5: memref<64x128xf32, #tpu.memory_space<vmem>>, %arg6: memref<1x128xf32, #tpu.memory_space<vmem>>, %arg7: memref<9x64xf32, #tpu.memory_space<vmem>>, %arg8: memref<1x64xf32, #tpu.memory_space<vmem>>, %arg9: memref<64x64xf32, #tpu.memory_space<vmem>>, %arg10: memref<1x64xf32, #tpu.memory_space<vmem>>, %arg11: memref<1x64x64xf32, #tpu.memory_space<vmem>>, %arg12: memref<9x8x128xf32, #tpu.memory_space<vmem>>) attributes {dimension_semantics = [#tpu.dimension_semantics<parallel>, #tpu.dimension_semantics<parallel>], iteration_bounds = array<i64: 2, 1>, scalar_prefetch = 0 : i64, scratch_operands = 1 : i64, tpu.core_type = #tpu.core_type<tc>, window_params = [{transform_indices = @transform_0, window_bounds = array<i64: 1, 8, 1, 8, 64>}, {transform_indices = @transform_1, window_bounds = array<i64: 1, 8, 1, 8, 64>}, {transform_indices = @transform_2, window_bounds = array<i64: 1, 1, 1, 8, 64>}, {pipeline_mode = #tpu.pipeline_mode<synchronous>, transform_indices = @transform_3, window_bounds = array<i64: 64, 128>}, {pipeline_mode = #tpu.pipeline_mode<synchronous>, transform_indices = @transform_4, window_bounds = array<i64: 1, 128>}, {pipeline_mode = #tpu.pipeline_mode<synchronous>, transform_indices = @transform_5, window_bounds = array<i64: 9, 64>}, {pipeline_mode = #tpu.pipeline_mode<synchronous>, transform_indices = @transform_6, window_bounds = array<i64: 1, 64>}, {pipeline_mode = #tpu.pipeline_mode<synchronous>, transform_indices = @transform_7, window_bounds = array<i64: 64, 64>}, {pipeline_mode = #tpu.pipeline_mode<synchronous>, transform_indices = @transform_8, window_bounds = array<i64: 1, 64>}, {transform_indices = @transform_9, window_bounds = array<i64: 1, 64, 64>}]} {
    %c0 = arith.constant 0 : index
    %c0_0 = arith.constant 0 : index
    %0 = vector.load %arg5[%c0, %c0_0] : memref<64x128xf32, #tpu.memory_space<vmem>>, vector<64x128xf32>
    %c0_1 = arith.constant 0 : index
    %c0_2 = arith.constant 0 : index
    %1 = vector.load %arg6[%c0_1, %c0_2] : memref<1x128xf32, #tpu.memory_space<vmem>>, vector<1x128xf32>
    %c0_3 = arith.constant 0 : index
    %c0_4 = arith.constant 0 : index
    %c0_5 = arith.constant 0 : index
    %c0_6 = arith.constant 0 : index
    %c0_7 = arith.constant 0 : index
    %2 = vector.load %arg2[%c0_3, %c0_4, %c0_5, %c0_6, %c0_7] : memref<1x8x1x8x64xf32, #tpu.memory_space<vmem>>, vector<1x8x1x8x64xf32>
    %3 = vector.shape_cast %2 : vector<1x8x1x8x64xf32> to vector<8x8x64xf32>
    %4 = vector.shape_cast %3 : vector<8x8x64xf32> to vector<64x64xf32>
    %cst = arith.constant dense<0.000000e+00> : vector<64x128xf32>
    %5 = tpu.matmul %4, %0, %cst {dimension_numbers = #tpu.dot_dimension_numbers<[1], [0], [0], [1], [0, 0, 1, 1], [], []>} : vector<64x64xf32>, vector<64x128xf32>, vector<64x128xf32> -> vector<64x128xf32>
    %6 = vector.broadcast %1 : vector<1x128xf32> to vector<64x128xf32>
    %7 = arith.addf %5, %6 : vector<64x128xf32>
    %cst_8 = arith.constant 5.000000e-01 : f32
    %8 = vector.broadcast %cst_8 : f32 to vector<64x128xf32>
    %9 = arith.mulf %8, %7 : vector<64x128xf32>
    %cst_9 = arith.constant 0.707106769 : f32
    %10 = vector.broadcast %cst_9 : f32 to vector<64x128xf32>
    %11 = arith.mulf %7, %10 : vector<64x128xf32>
    %12 = math.erf %11 : vector<64x128xf32>
    %cst_10 = arith.constant 1.000000e+00 : f32
    %13 = vector.broadcast %cst_10 : f32 to vector<64x128xf32>
    %14 = arith.addf %13, %12 : vector<64x128xf32>
    %15 = arith.mulf %9, %14 : vector<64x128xf32>
    %16 = vector.shape_cast %15 : vector<64x128xf32> to vector<8x8x128xf32>
    %c0_11 = arith.constant 0 : index
    %c0_12 = arith.constant 0 : index
    %c0_13 = arith.constant 0 : index
    %c0_14 = arith.constant 0 : index
    %c0_15 = arith.constant 0 : index
    %17 = vector.load %arg3[%c0_11, %c0_12, %c0_13, %c0_14, %c0_15] : memref<1x8x1x8x64xf32, #tpu.memory_space<vmem>>, vector<1x8x1x8x64xf32>
    %18 = vector.shape_cast %17 : vector<1x8x1x8x64xf32> to vector<8x8x64xf32>
    %19 = vector.shape_cast %18 : vector<8x8x64xf32> to vector<64x64xf32>
    %cst_16 = arith.constant dense<0.000000e+00> : vector<64x128xf32>
    %20 = tpu.matmul %19, %0, %cst_16 {dimension_numbers = #tpu.dot_dimension_numbers<[1], [0], [0], [1], [0, 0, 1, 1], [], []>} : vector<64x64xf32>, vector<64x128xf32>, vector<64x128xf32> -> vector<64x128xf32>
    %21 = vector.broadcast %1 : vector<1x128xf32> to vector<64x128xf32>
    %22 = arith.addf %20, %21 : vector<64x128xf32>
    %cst_17 = arith.constant 5.000000e-01 : f32
    %23 = vector.broadcast %cst_17 : f32 to vector<64x128xf32>
    %24 = arith.mulf %23, %22 : vector<64x128xf32>
    %cst_18 = arith.constant 0.707106769 : f32
    %25 = vector.broadcast %cst_18 : f32 to vector<64x128xf32>
    %26 = arith.mulf %22, %25 : vector<64x128xf32>
    %27 = math.erf %26 : vector<64x128xf32>
    %cst_19 = arith.constant 1.000000e+00 : f32
    %28 = vector.broadcast %cst_19 : f32 to vector<64x128xf32>
    %29 = arith.addf %28, %27 : vector<64x128xf32>
    %30 = arith.mulf %24, %29 : vector<64x128xf32>
    %31 = vector.shape_cast %30 : vector<64x128xf32> to vector<8x8x128xf32>
    %c0_20 = arith.constant 0 : index
    %c0_21 = arith.constant 0 : index
    %c0_22 = arith.constant 0 : index
    %c0_23 = arith.constant 0 : index
    %c0_24 = arith.constant 0 : index
    %32 = vector.load %arg4[%c0_20, %c0_21, %c0_22, %c0_23, %c0_24] : memref<1x1x1x8x64xf32, #tpu.memory_space<vmem>>, vector<1x1x1x8x64xf32>
    %33 = vector.shape_cast %32 : vector<1x1x1x8x64xf32> to vector<8x64xf32>
    %cst_25 = arith.constant dense<0.000000e+00> : vector<8x128xf32>
    %34 = tpu.matmul %33, %0, %cst_25 {dimension_numbers = #tpu.dot_dimension_numbers<[1], [0], [0], [1], [0, 0, 1, 1], [], []>} : vector<8x64xf32>, vector<64x128xf32>, vector<8x128xf32> -> vector<8x128xf32>
    %35 = vector.broadcast %1 : vector<1x128xf32> to vector<8x128xf32>
    %36 = arith.addf %34, %35 : vector<8x128xf32>
    %cst_26 = arith.constant 5.000000e-01 : f32
    %37 = vector.broadcast %cst_26 : f32 to vector<8x128xf32>
    %38 = arith.mulf %37, %36 : vector<8x128xf32>
    %cst_27 = arith.constant 0.707106769 : f32
    %39 = vector.broadcast %cst_27 : f32 to vector<8x128xf32>
    %40 = arith.mulf %36, %39 : vector<8x128xf32>
    %41 = math.erf %40 : vector<8x128xf32>
    %cst_28 = arith.constant 1.000000e+00 : f32
    %42 = vector.broadcast %cst_28 : f32 to vector<8x128xf32>
    %43 = arith.addf %42, %41 : vector<8x128xf32>
    %44 = arith.mulf %38, %43 : vector<8x128xf32>
    %c0_i32 = arith.constant 0 : i32
    %45 = arith.cmpi eq, %arg1, %c0_i32 : i32
    %cst_29 = arith.constant 0.000000e+00 : f32
    %46 = vector.broadcast %cst_29 : f32 to vector<8x128xf32>
    %47 = arith.select %45, %46, %44 : vector<8x128xf32>
    %c0_30 = arith.constant 0 : index
    %c0_31 = arith.constant 0 : index
    %c0_32 = arith.constant 0 : index
    %48 = vector.load %arg12[%c0_30, %c0_31, %c0_32] : memref<9x8x128xf32, #tpu.memory_space<vmem>>, vector<1x8x128xf32>
    %49 = vector.shape_cast %48 : vector<1x8x128xf32> to vector<8x128xf32>
    %50 = vector.shape_cast %47 : vector<8x128xf32> to vector<1x8x128xf32>
    tpu.vector_store %arg12[%c0_30, %c0_31, %c0_32], %50 {strides = array<i32>} : memref<9x8x128xf32, #tpu.memory_space<vmem>>, vector<1x8x128xf32>,
    %c1 = arith.constant 1 : index
    %c0_33 = arith.constant 0 : index
    %c0_34 = arith.constant 0 : index
    %51 = vector.load %arg12[%c1, %c0_33, %c0_34] : memref<9x8x128xf32, #tpu.memory_space<vmem>>, vector<8x8x128xf32>
    tpu.vector_store %arg12[%c1, %c0_33, %c0_34], %31 {strides = array<i32>} : memref<9x8x128xf32, #tpu.memory_space<vmem>>, vector<8x8x128xf32>,
    %c0_35 = arith.constant 0 : index
    %c0_36 = arith.constant 0 : index
    %c0_37 = arith.constant 0 : index
    %52 = vector.load %arg12[%c0_35, %c0_36, %c0_37] : memref<9x8x128xf32, #tpu.memory_space<vmem>>, vector<8x8x128xf32>
    %c0_38 = arith.constant 0 : index
    %c0_39 = arith.constant 0 : index
    %53 = vector.load %arg7[%c0_38, %c0_39] : memref<9x64xf32, #tpu.memory_space<vmem>>, vector<9x64xf32>
    %cst_40 = arith.constant 0.000000e+00 : f32
    %54 = vector.broadcast %cst_40 : f32 to vector<8x1x64xf32>
    %cst_41 = arith.constant 0.000000e+00 : f32
    %55 = vector.broadcast %cst_41 : f32 to vector<8x8x64xf32>
    %56 = vector.extract_strided_slice %52 {offsets = [0, 0, 0], sizes = [8, 8, 64], strides = [1, 1, 1]} : vector<8x8x128xf32> to vector<8x8x64xf32>
    %57 = vector.extract_strided_slice %52 {offsets = [0, 0, 64], sizes = [8, 8, 64], strides = [1, 1, 1]} : vector<8x8x128xf32> to vector<8x8x64xf32>
    %58 = vector.extract_strided_slice %57 {offsets = [0, 0, 0], sizes = [8, 7, 64], strides = [1, 1, 1]} : vector<8x8x64xf32> to vector<8x7x64xf32>
    %59 = tpu.concatenate %54, %58 in 1 : vector<8x1x64xf32>, vector<8x7x64xf32> -> vector<8x8x64xf32>
    %60 = vector.extract_strided_slice %53 {offsets = [0, 0], sizes = [1, 64], strides = [1, 1]} : vector<9x64xf32> to vector<1x64xf32>
    %61 = vector.shape_cast %60 : vector<1x64xf32> to vector<64xf32>
    %62 = vector.shape_cast %61 : vector<64xf32> to vector<1x1x64xf32>
    %63 = vector.broadcast %62 : vector<1x1x64xf32> to vector<8x8x64xf32>
    %64 = arith.mulf %59, %63 : vector<8x8x64xf32>
    %65 = arith.addf %55, %64 : vector<8x8x64xf32>
    %66 = vector.extract_strided_slice %53 {offsets = [1, 0], sizes = [1, 64], strides = [1, 1]} : vector<9x64xf32> to vector<1x64xf32>
    %67 = vector.shape_cast %66 : vector<1x64xf32> to vector<64xf32>
    %68 = vector.shape_cast %67 : vector<64xf32> to vector<1x1x64xf32>
    %69 = vector.broadcast %68 : vector<1x1x64xf32> to vector<8x8x64xf32>
    %70 = arith.mulf %56, %69 : vector<8x8x64xf32>
    %71 = arith.addf %65, %70 : vector<8x8x64xf32>
    %72 = vector.extract_strided_slice %53 {offsets = [2, 0], sizes = [1, 64], strides = [1, 1]} : vector<9x64xf32> to vector<1x64xf32>
    %73 = vector.shape_cast %72 : vector<1x64xf32> to vector<64xf32>
    %74 = vector.shape_cast %73 : vector<64xf32> to vector<1x1x64xf32>
    %75 = vector.broadcast %74 : vector<1x1x64xf32> to vector<8x8x64xf32>
    %76 = arith.mulf %57, %75 : vector<8x8x64xf32>
    %77 = arith.addf %71, %76 : vector<8x8x64xf32>
    %78 = vector.extract_strided_slice %16 {offsets = [0, 0, 0], sizes = [8, 8, 64], strides = [1, 1, 1]} : vector<8x8x128xf32> to vector<8x8x64xf32>
    %79 = vector.extract_strided_slice %16 {offsets = [0, 0, 64], sizes = [8, 8, 64], strides = [1, 1, 1]} : vector<8x8x128xf32> to vector<8x8x64xf32>
    %80 = vector.extract_strided_slice %79 {offsets = [0, 0, 0], sizes = [8, 7, 64], strides = [1, 1, 1]} : vector<8x8x64xf32> to vector<8x7x64xf32>
    %81 = tpu.concatenate %54, %80 in 1 : vector<8x1x64xf32>, vector<8x7x64xf32> -> vector<8x8x64xf32>
    %82 = vector.extract_strided_slice %53 {offsets = [3, 0], sizes = [1, 64], strides = [1, 1]} : vector<9x64xf32> to vector<1x64xf32>
    %83 = vector.shape_cast %82 : vector<1x64xf32> to vector<64xf32>
    %84 = vector.shape_cast %83 : vector<64xf32> to vector<1x1x64xf32>
    %85 = vector.broadcast %84 : vector<1x1x64xf32> to vector<8x8x64xf32>
    %86 = arith.mulf %81, %85 : vector<8x8x64xf32>
    %87 = arith.addf %77, %86 : vector<8x8x64xf32>
    %88 = vector.extract_strided_slice %53 {offsets = [4, 0], sizes = [1, 64], strides = [1, 1]} : vector<9x64xf32> to vector<1x64xf32>
    %89 = vector.shape_cast %88 : vector<1x64xf32> to vector<64xf32>
    %90 = vector.shape_cast %89 : vector<64xf32> to vector<1x1x64xf32>
    %91 = vector.broadcast %90 : vector<1x1x64xf32> to vector<8x8x64xf32>
    %92 = arith.mulf %78, %91 : vector<8x8x64xf32>
    %93 = arith.addf %87, %92 : vector<8x8x64xf32>
    %94 = vector.extract_strided_slice %53 {offsets = [5, 0], sizes = [1, 64], strides = [1, 1]} : vector<9x64xf32> to vector<1x64xf32>
    %95 = vector.shape_cast %94 : vector<1x64xf32> to vector<64xf32>
    %96 = vector.shape_cast %95 : vector<64xf32> to vector<1x1x64xf32>
    %97 = vector.broadcast %96 : vector<1x1x64xf32> to vector<8x8x64xf32>
    %98 = arith.mulf %79, %97 : vector<8x8x64xf32>
    %99 = arith.addf %93, %98 : vector<8x8x64xf32>
    %100 = vector.extract_strided_slice %31 {offsets = [0, 0, 0], sizes = [8, 8, 64], strides = [1, 1, 1]} : vector<8x8x128xf32> to vector<8x8x64xf32>
    %101 = vector.extract_strided_slice %31 {offsets = [0, 0, 64], sizes = [8, 8, 64], strides = [1, 1, 1]} : vector<8x8x128xf32> to vector<8x8x64xf32>
    %102 = vector.extract_strided_slice %101 {offsets = [0, 0, 0], sizes = [8, 7, 64], strides = [1, 1, 1]} : vector<8x8x64xf32> to vector<8x7x64xf32>
    %103 = tpu.concatenate %54, %102 in 1 : vector<8x1x64xf32>, vector<8x7x64xf32> -> vector<8x8x64xf32>
    %104 = vector.extract_strided_slice %53 {offsets = [6, 0], sizes = [1, 64], strides = [1, 1]} : vector<9x64xf32> to vector<1x64xf32>
    %105 = vector.shape_cast %104 : vector<1x64xf32> to vector<64xf32>
    %106 = vector.shape_cast %105 : vector<64xf32> to vector<1x1x64xf32>
    %107 = vector.broadcast %106 : vector<1x1x64xf32> to vector<8x8x64xf32>
    %108 = arith.mulf %103, %107 : vector<8x8x64xf32>
    %109 = arith.addf %99, %108 : vector<8x8x64xf32>
    %110 = vector.extract_strided_slice %53 {offsets = [7, 0], sizes = [1, 64], strides = [1, 1]} : vector<9x64xf32> to vector<1x64xf32>
    %111 = vector.shape_cast %110 : vector<1x64xf32> to vector<64xf32>
    %112 = vector.shape_cast %111 : vector<64xf32> to vector<1x1x64xf32>
    %113 = vector.broadcast %112 : vector<1x1x64xf32> to vector<8x8x64xf32>
    %114 = arith.mulf %100, %113 : vector<8x8x64xf32>
    %115 = arith.addf %109, %114 : vector<8x8x64xf32>
    %116 = vector.extract_strided_slice %53 {offsets = [8, 0], sizes = [1, 64], strides = [1, 1]} : vector<9x64xf32> to vector<1x64xf32>
    %117 = vector.shape_cast %116 : vector<1x64xf32> to vector<64xf32>
    %118 = vector.shape_cast %117 : vector<64xf32> to vector<1x1x64xf32>
    %119 = vector.broadcast %118 : vector<1x1x64xf32> to vector<8x8x64xf32>
    %120 = arith.mulf %101, %119 : vector<8x8x64xf32>
    %121 = arith.addf %115, %120 : vector<8x8x64xf32>
    %c0_42 = arith.constant 0 : index
    %c0_43 = arith.constant 0 : index
    %122 = vector.load %arg8[%c0_42, %c0_43] : memref<1x64xf32, #tpu.memory_space<vmem>>, vector<1x64xf32>
    %123 = vector.shape_cast %122 : vector<1x64xf32> to vector<1x1x64xf32>
    %124 = vector.broadcast %123 : vector<1x1x64xf32> to vector<8x8x64xf32>
    %125 = arith.addf %121, %124 : vector<8x8x64xf32>
    %cst_44 = arith.constant 5.000000e-01 : f32
    %126 = vector.broadcast %cst_44 : f32 to vector<8x8x64xf32>
    %127 = arith.mulf %126, %125 : vector<8x8x64xf32>
    %cst_45 = arith.constant 0.707106769 : f32
    %128 = vector.broadcast %cst_45 : f32 to vector<8x8x64xf32>
    %129 = arith.mulf %125, %128 : vector<8x8x64xf32>
    %130 = math.erf %129 : vector<8x8x64xf32>
    %cst_46 = arith.constant 1.000000e+00 : f32
    %131 = vector.broadcast %cst_46 : f32 to vector<8x8x64xf32>
    %132 = arith.addf %131, %130 : vector<8x8x64xf32>
    %133 = arith.mulf %127, %132 : vector<8x8x64xf32>
    %134 = vector.shape_cast %133 : vector<8x8x64xf32> to vector<64x64xf32>
    %c0_47 = arith.constant 0 : index
    %c0_48 = arith.constant 0 : index
    %135 = vector.load %arg9[%c0_47, %c0_48] : memref<64x64xf32, #tpu.memory_space<vmem>>, vector<64x64xf32>
    %cst_49 = arith.constant dense<0.000000e+00> : vector<64x64xf32>
    %136 = tpu.matmul %134, %135, %cst_49 {dimension_numbers = #tpu.dot_dimension_numbers<[1], [0], [0], [1], [0, 0, 1, 1], [], []>} : vector<64x64xf32>, vector<64x64xf32>, vector<64x64xf32> -> vector<64x64xf32>
    %c0_50 = arith.constant 0 : index
    %c0_51 = arith.constant 0 : index
    %137 = vector.load %arg10[%c0_50, %c0_51] : memref<1x64xf32, #tpu.memory_space<vmem>>, vector<1x64xf32>
    %138 = vector.broadcast %137 : vector<1x64xf32> to vector<64x64xf32>
    %139 = arith.addf %136, %138 : vector<64x64xf32>
    %c0_52 = arith.constant 0 : index
    %c0_53 = arith.constant 0 : index
    %c0_54 = arith.constant 0 : index
    %140 = vector.load %arg11[%c0_52, %c0_53, %c0_54] : memref<1x64x64xf32, #tpu.memory_space<vmem>>, vector<1x64x64xf32>
    %141 = vector.shape_cast %140 : vector<1x64x64xf32> to vector<64x64xf32>
    %142 = vector.shape_cast %139 : vector<64x64xf32> to vector<1x64x64xf32>
    tpu.vector_store %arg11[%c0_52, %c0_53, %c0_54], %142 {strides = array<i32>} : memref<1x64x64xf32, #tpu.memory_space<vmem>>, vector<1x64x64xf32>,
    return
  }
  func.func @transform_0(%arg0: i32, %arg1: i32) -> (i32, i32, i32, i32, i32) {
    %c0_i32 = arith.constant 0 : i32
    %c0_i32_0 = arith.constant 0 : i32
    %c0_i32_1 = arith.constant 0 : i32
    %c0_i32_2 = arith.constant 0 : i32
    return %arg0, %arg1, %c0_i32, %c0_i32_0, %c0_i32_1 : i32, i32, i32, i32, i32
  }
  func.func @transform_1(%arg0: i32, %arg1: i32) -> (i32, i32, i32, i32, i32) {
    %c1_i32 = arith.constant 1 : i32
    %c0_i32 = arith.constant 0 : i32
    %c0_i32_0 = arith.constant 0 : i32
    %c0_i32_1 = arith.constant 0 : i32
    return %arg0, %arg1, %c1_i32, %c0_i32, %c0_i32_0 : i32, i32, i32, i32, i32
  }
  func.func @transform_2(%arg0: i32, %arg1: i32) -> (i32, i32, i32, i32, i32) {
    %c8_i32 = arith.constant 8 : i32
    %0 = arith.muli %arg1, %c8_i32 : i32
    %c1_i32 = arith.constant 1 : i32
    %1 = arith.subi %0, %c1_i32 : i32
    %c0_i32 = arith.constant 0 : i32
    %2 = arith.maxsi %1, %c0_i32 : i32
    %c1_i32_0 = arith.constant 1 : i32
    %c0_i32_1 = arith.constant 0 : i32
    %c0_i32_2 = arith.constant 0 : i32
    %c0_i32_3 = arith.constant 0 : i32
    return %arg0, %2, %c1_i32_0, %c0_i32_1, %c0_i32_2 : i32, i32, i32, i32, i32
  }
  func.func @transform_3(%arg0: i32, %arg1: i32) -> (i32, i32) {
    %c0_i32 = arith.constant 0 : i32
    %c0_i32_0 = arith.constant 0 : i32
    %c0_i32_1 = arith.constant 0 : i32
    return %c0_i32, %c0_i32_0 : i32, i32
  }
  func.func @transform_4(%arg0: i32, %arg1: i32) -> (i32, i32) {
    %c0_i32 = arith.constant 0 : i32
    %c0_i32_0 = arith.constant 0 : i32
    %c0_i32_1 = arith.constant 0 : i32
    return %c0_i32, %c0_i32_0 : i32, i32
  }
  func.func @transform_5(%arg0: i32, %arg1: i32) -> (i32, i32) {
    %c0_i32 = arith.constant 0 : i32
    %c0_i32_0 = arith.constant 0 : i32
    %c0_i32_1 = arith.constant 0 : i32
    return %c0_i32, %c0_i32_0 : i32, i32
  }
  func.func @transform_6(%arg0: i32, %arg1: i32) -> (i32, i32) {
    %c0_i32 = arith.constant 0 : i32
    %c0_i32_0 = arith.constant 0 : i32
    %c0_i32_1 = arith.constant 0 : i32
    return %c0_i32, %c0_i32_0 : i32, i32
  }
  func.func @transform_7(%arg0: i32, %arg1: i32) -> (i32, i32) {
    %c0_i32 = arith.constant 0 : i32
    %c0_i32_0 = arith.constant 0 : i32
    %c0_i32_1 = arith.constant 0 : i32
    return %c0_i32, %c0_i32_0 : i32, i32
  }
  func.func @transform_8(%arg0: i32, %arg1: i32) -> (i32, i32) {
    %c0_i32 = arith.constant 0 : i32
    %c0_i32_0 = arith.constant 0 : i32
    %c0_i32_1 = arith.constant 0 : i32
    return %c0_i32, %c0_i32_0 : i32, i32
  }
  func.func @transform_9(%arg0: i32, %arg1: i32) -> (i32, i32, i32) {
    %c0_i32 = arith.constant 0 : i32
    %c0_i32_0 = arith.constant 0 : i32
    return %arg0, %arg1, %c0_i32 : i32, i32, i32
  }
}

</mosaic_0001>

<bundles_post_ra>
// kernel: tpu_custom_call.1
= control target key start
LH: loop header
LB: loop body
LE: loop exit
PB: predicated region body
PF: predicated region fallthrough
CT: control target
= control target key end

     0   :  { %s3298_s0 = inlined_call_operand.hbm [shape: f32[2,8,2,8,64], index: 0, kind: input, shape index: {}]   ;;  %s3299_s1 = inlined_call_operand.hbm [shape: f32[2,8,2,8,64], index: 1, kind: input, shape index: {}]   ;;  %s3300_s2 = inlined_call_operand.hbm [shape: f32[2,8,2,8,64], index: 2, kind: input, shape index: {}]   ;;  %s3301_s3 = inlined_call_operand.hbm [shape: f32[64,128], index: 3, kind: input, shape index: {}]   ;;  %s3302_s4 = inlined_call_operand.vmem [shape: f32[1,128], index: 4, kind: input, shape index: {}]   ;;  %s3303_s5 = inlined_call_operand.hbm [shape: f32[9,64], index: 5, kind: input, shape index: {}]   ;;  %s3304_s6 = inlined_call_operand.vmem [shape: f32[1,64], index: 6, kind: input, shape index: {}]   ;;  %s3305_s7 = inlined_call_operand.hbm [shape: f32[64,64], index: 7, kind: input, shape index: {}]   ;;  %s3306_s8 = inlined_call_operand.vmem [shape: f32[1,64], index: 8, kind: input, shape index: {}]   ;;  %s3307_s9 = inlined_call_operand.hbm [shape: f32[2,64,64], index: 9, kind: output, shape index: {}]  }
   0x1   :  { %3322 = sst [smem:[#allocation24_spill]] %s3298_s0 }
   0x2   :  { %3323 = sst [smem:[#allocation25_spill]] %s3299_s1 }
   0x3   :  { %3324 = sst [smem:[#allocation26_spill]] %s3301_s3 }
   0x4   :  { %3325 = sst [smem:[#allocation27_spill]] %s3303_s5 }
   0x5   :  { %3326 = sst [smem:[#allocation28_spill]] %s3304_s6 }
   0x6   :  { %3327 = sst [smem:[#allocation29_spill]] %s3305_s7 }
   0x7   :  { %3328 = sst [smem:[#allocation30_spill]] %s3306_s8 }
   0x8   :  { %3329 = sst [smem:[#allocation31_spill]] %s3307_s9 }
   0x9   :  { %14 = vsyncpa [#allocation4], 0 }
   0xa   :  { %16 = vsyncpa [#allocation4 + $0x1], 0 }
   0xb   :  { %17 = vsyncpa [#allocation7], 0 }
   0xc   :  { %19 = vsyncpa [#allocation7 + $0x1], 0 }
   0xd   :  { %20 = vsyncpa [#allocation10], 0 }
   0xe   :  { %21 = vsyncpa [#allocation13], 0 }
   0xf   :  { %22 = vsyncpa [#allocation5], 0 }
  0x10   :  { %24 = vsyncpa [#allocation5 + $0x1], 0  ;;  %s2520_s30 = smov 0   ;;  %s2522_s10 = smov 0  }
  0x11   :  { %s2524_s11 = smov 0   ;;  %s2526_s12 = smov 0  }
  0x12   :  { %s2528_s13 = smov 0   ;;  %s2530_s14 = smov 0  }
  0x13 LB: > { %3330 = sst [smem:[#allocation20_spill]] %s2433_s30  ;;  %s2551_s15 = sadd.s32 4294967295, %s2453_s14   ;;  %s2453_s14 = sphi %s2530_s14, %s30_s14   ;;  %s2449_s13 = sphi %s2528_s13, %s3372_s13   ;;  %s2445_s12 = sphi %s2526_s12, %s3371_s12   ;;  %s2441_s11 = sphi %s2524_s11, %s3370_s11   ;;  %s2437_s10 = sphi %s2522_s10, %s3369_s10   ;;  %s2433_s30 = sphi %s2520_s30, %s3368_s30  }
  0x14   : > { %3331 = sst [smem:[#allocation21_spill]] %s2445_s12  ;;  %s1817_s16 = sadd.s32 4294967294, %s2453_s14  }
  0x15   : > { %p58_p0 = scmp.ne.s32.totalorder %s2441_s11, %s2437_s10  ;;  %p59_p1 = scmp.eq.s32.totalorder %s2453_s14, 0 }
  0x16   : > { %p64_p2 = scmp.ne.s32.totalorder %s2437_s10, %s2433_s30  ;;  %p3308_p3 = scmp.eq.s32.totalorder %s2551_s15, 0 }
  0x17   : > { %p280_p4 = scmp.eq.s32.totalorder %s2551_s15, 1  ;;  %p2562_p5 = por %p59_p1, %p58_p0 }
  0x18   : > { %p286_p6 = scmp.eq.s32.totalorder %s1817_s16, 1  ;;  %p2568_p7 = por %p3308_p3, %p64_p2 }
  0x19   : > { %p2572_p8 = por %p280_p4, %p58_p0  ;;  %p1818_p10 = scmp.ge.s32.totalorder %s2453_s14, 1 }
  0x1a   : > { %p2576_p9 = por %p286_p6, %p64_p2  ;;  %p293_p11 = scmp.lt.s32.totalorder %s2453_s14, 3 }
  0x1b   : > { %s3334_s20 = scalar_select %p2572_p8, 1, 0 }
  0x1c   : > { %s3336_s21 = scalar_select %p2576_p9, 1, 0 }
  0x1d   : > { %3335 = sst [smem:[#allocation22_spill]] %s3334_s20  ;;  %p2582_p12 = pnand %p1818_p10, %p293_p11 }
  0x1e   : > { %3337 = sst [smem:[#allocation23_spill]] %s3336_s21  ;;  %s2455_s23 = smov [#allocation9]  }
  0x1f   : > { %s305_s24 = sshll.u32 %s2455_s23, 4  ;;  %p2058_p13 = pneg %p2582_p12  ;;  %s306_s24 = int_to_ptr.vmem [resolvable:$true] %s305_s24 }
  0x20   : > { %p2085_p1 = scmp.lt.s32.totalorder %s2453_s14, 2  ;;  %s42_s27 = sadd.s32 1, %s2449_s13 }
  0x21   : > { %p2592_p4 = pnand %p2058_p13, %p3308_p3  ;;  %p2603_p6 = scmp.ge.s32.totalorder %s42_s27, 2 }
  0x22   : > { %p2598_p2 = pnand %p2085_p1, %p2562_p5  ;;  %s2208_s29 = scalar_lea.vmem %s306_s24, 1024 }
  0x23   : > { %p2199_p10 = pneg %p2592_p4  ;;  %p2209_p11 = scmp.ne.s32.totalorder %s306_s24, %s2208_s29 }
  0x24   : > { %p2216_p3 = scmp.lt.s32.totalorder %s306_s24, %s306_s24  ;;  %p2217_p9 = scmp.lt.s32.totalorder %s2208_s29, %s2208_s29 }
  0x25   : > { %p2211_p13 = pnand %p2209_p11, %p2199_p10 }
  0x26   : > { %p2218_p8 = por %p2217_p9, %p2216_p3 }
  0x27   : > { %p2212_p0 = pneg %p2211_p13 }
  0x29   : > { %p2219_p5 = pnand %p2218_p8, %p2212_p0 }
  0x2b   : > { %2222 = shalt.err (!%p2219_p5)
}
  0x2c   : > { %s3315_s16 = smov 128   ;;  %s3317_s18 = smov 8  }
  0x2d   : > { %s3342_s3 = sld [smem:[#allocation26_spill]]  ;;  %s2621_s29 = sand.u32 1, %s2441_s11  }
  0x2e   : > { %s3374_s27 = smov (%p2603_p6, %s42_s27), 0  ;;  %s3319_s21 = sshll.u32 %s2621_s29, 6 }
  0x2f   : > { %s2629_s30 = sshll.u32 %s2449_s13, 11  ;;  %s46_s9 = ssub.s32 %s2449_s13, %s3374_s27 }
  0x30   : > { %p49_p3 = scmp.eq.s32.totalorder %s46_s9, 0  ;;  %s378_s20 = sand.u32 1, %s2453_s14  }
  0x31   : > { %s3343_s12 = sadd.s32 1, %s2441_s11  ;;  %s3344_s1 = sld [smem:[#allocation25_spill]] }
  0x32   : > { %s2637_s17 = scalar_select %p49_p3, %s2441_s11, %s3343_s12  }
  0x33   : > { %2061 = dma.hbm_to_vmem [thread:$0]  (!%p2592_p4), %s3342_s3, 1024, %s306_s24, [#allocation10], %s3315_s16, %s3315_s16, %s3317_s18  }
  0x34   : > { %s382_s16 = scalar_lea.vmem [#allocation6], %s3319_s21  ;;  %s2645_s8 = scalar_lea.sflag [#allocation7], %s378_s20 }
  0x35   : > { %s393_s18 = sshll.u32 %s382_s16, 4  ;;  %p3320_p8 = pneg %p2598_p2  ;;  %s394_s18 = int_to_ptr.vmem [resolvable:$true] %s393_s18 }
  0x36   : > { %s2236_s6 = scalar_lea.vmem %s394_s18, 1024  ;;  %s2458_s9 = smov [#allocation6]  }
  0x37   : > { %s1696_s28 = scalar_lea.hbm %s3344_s1, %s2629_s30  ;;  %p2237_p9 = scmp.ne.s32.totalorder %s394_s18, %s2236_s6 }
  0x38   : > { %s1697_s3 = scalar_lea.hbm %s1696_s28, 128  ;;  %s2241_s12 = sshll.u32 %s2458_s9, 4  ;;  %s2242_s12 = int_to_ptr.vmem [resolvable:$false] %s2241_s12 }
  0x39   : > { %p2239_p0 = pnand %p2237_p9, %p3320_p8  ;;  %s2243_s24 = scalar_lea.vmem %s2242_s12, 2048 }
  0x3a   : > { %p2244_p6 = scmp.lt.s32.totalorder %s394_s18, %s2242_s12  ;;  %p2245_p11 = scmp.lt.s32.totalorder %s2243_s24, %s2236_s6 }
  0x3b   : > { %p2240_p1 = pneg %p2239_p0 }
  0x3c   : > { %p2246_p13 = por %p2245_p11, %p2244_p6 }
  0x3e   : > { %p2247_p5 = pnand %p2246_p13, %p2240_p1 }
  0x40   : > { %2250 = shalt.err (!%p2247_p5)
}
  0x41   : > { %s3321_s16 = smov 256   ;;  %s3345_s20 = smov 8  }
  0x42   : > { %s3346_s23 = smov 128   ;;  %s2460_s28 = smov [#allocation11]  }
  0x43   : > { %2074 = dma.hbm_to_vmem [thread:$0]  (!%p2598_p2), %s1697_s3, 1024, %s394_s18, %s2645_s8, %s3321_s16, %s3346_s23, %s3345_s20  }
  0x44   : > { %s321_s21 = sshll.u32 %s2460_s28, 4  ;;  %s2461_s1 = smov [#allocation12]   ;;  %s322_s21 = int_to_ptr.vmem [resolvable:$true] %s321_s21 }
  0x45   : > { %s337_s9 = sshll.u32 %s2461_s1, 4  ;;  %s2263_s12 = scalar_lea.vmem %s322_s21, 256  ;;  %s338_s9 = int_to_ptr.vmem [resolvable:$true] %s337_s9 }
  0x46   : > { %p2264_p3 = scmp.ne.s32.totalorder %s322_s21, %s2263_s12  ;;  %p2271_p1 = scmp.lt.s32.totalorder %s322_s21, %s322_s21 }
  0x47   : > { %p2272_p6 = scmp.lt.s32.totalorder %s2263_s12, %s2263_s12 }
  0x48   : > { %p2266_p9 = pnand %p2264_p3, %p2199_p10 }
  0x49   : > { %p2273_p11 = por %p2272_p6, %p2271_p1 }
  0x4a   : > { %p2267_p0 = pneg %p2266_p9 }
  0x4c   : > { %p2274_p13 = pnand %p2273_p11, %p2267_p0 }
  0x4e   : > { %2277 = shalt.err (!%p2274_p13)
}
  0x4f   : > { %s3347_s5 = sld [smem:[#allocation27_spill]]  ;;  %s2289_s6 = scalar_lea.vmem %s338_s9, 1024 }
  0x50   : > { %p2290_p5 = scmp.ne.s32.totalorder %s338_s9, %s2289_s6  ;;  %p2297_p8 = scmp.lt.s32.totalorder %s338_s9, %s338_s9 }
  0x51   : > { %p2298_p1 = scmp.lt.s32.totalorder %s2289_s6, %s2289_s6 }
  0x52   : > { %p2292_p3 = pnand %p2290_p5, %p2199_p10 }
  0x53   : > { %p2299_p0 = por %p2298_p1, %p2297_p8 }
  0x54   : > { %p2293_p9 = pneg %p2292_p3 }
  0x55   : > { %2064 = dma.hbm_to_vmem [thread:$0]  (!%p2592_p4), %s3347_s5, 256, %s322_s21, [#allocation10], %s3346_s23, %s3346_s23, %s3345_s20  }
  0x56   : > { %p2300_p6 = pnand %p2299_p0, %p2293_p9 }
  0x58   : > { %2303 = shalt.err (!%p2300_p6)
}
  0x59   : > { %s3348_s7 = sld [smem:[#allocation29_spill]]  ;;  %s3350_s3 = sshll.u32 %s2621_s29, 6 }
  0x5a   : > { %s3349_s0 = sld [smem:[#allocation24_spill]]  ;;  %s358_s1 = scalar_lea.vmem [#allocation3], %s3350_s3 }
  0x5b   : > { %s368_s6 = sshll.u32 %s358_s1, 4  ;;  %s1829_s25 = sshll.u32 %s2621_s29, 3  ;;  %s369_s6 = int_to_ptr.vmem [resolvable:$true] %s368_s6 }
  0x5c   : > { %s355_s16 = scalar_lea.sflag [#allocation4], %s2621_s29  ;;  %s2317_s5 = scalar_lea.vmem %s369_s6, 1024 }
  0x5d   : > { %p2318_p10 = scmp.ne.s32.totalorder %s369_s6, %s2317_s5  ;;  %p3351_p8 = pneg %p2598_p2 }
  0x5e   : > { %s2462_s18 = smov [#allocation3]  }
  0x5f   : > { %2067 = dma.hbm_to_vmem [thread:$0]  (!%p2592_p4), %s3348_s7, 1024, %s338_s9, [#allocation13], %s3346_s23, %s3346_s23, %s3345_s20  }
  0x60   : > { %s367_s12 = scalar_lea.hbm %s3349_s0, %s2629_s30  ;;  %p2320_p11 = pnand %p2318_p10, %p3351_p8 }
  0x61   : > { %s2322_s24 = sshll.u32 %s2462_s18, 4  ;;  %s2323_s24 = int_to_ptr.vmem [resolvable:$false] %s2322_s24 }
  0x62   : > { %p2321_p13 = pneg %p2320_p11  ;;  %s2324_s9 = scalar_lea.vmem %s2323_s24, 2048 }
  0x63   : > { %p2325_p4 = scmp.lt.s32.totalorder %s369_s6, %s2323_s24  ;;  %p2326_p5 = scmp.lt.s32.totalorder %s2324_s9, %s2317_s5 }
  0x65   : > { %p2327_p3 = por %p2326_p5, %p2325_p4 }
  0x67   : > { %p2328_p9 = pnand %p2327_p3, %p2321_p13 }
  0x69   : > { %2331 = shalt.err (!%p2328_p9)
}
  0x6a   : > { %s3352_s29 = smov 256   ;;  %s1705_s3 = scalar_lea.hbm %s3300_s2, %s2629_s30 }
  0x6b   : > { %2071 = dma.hbm_to_vmem [thread:$0]  (!%p2598_p2), %s367_s12, 1024, %s369_s6, %s355_s16, %s3352_s29, %s3346_s23, %s3345_s20  }
  0x6c   : > { %s1706_s1 = scalar_lea.hbm %s1705_s3, 128  ;;  %s407_s18 = scalar_lea.vmem [#allocation8], %s1829_s25 }
  0x6d   : > { %s422_s0 = sshll.u32 %s407_s18, 4  ;;  %p3353_p0 = pmov %p3351_p8  ;;  %s423_s0 = int_to_ptr.vmem [resolvable:$true] %s422_s0 }
  0x6e   : > { %s2345_s5 = scalar_lea.vmem %s423_s0, 128  ;;  %s2463_s24 = smov [#allocation8]  }
  0x6f   : > { %p2346_p1 = scmp.ne.s32.totalorder %s423_s0, %s2345_s5  ;;  %s2350_s9 = sshll.u32 %s2463_s24, 4  ;;  %s2351_s9 = int_to_ptr.vmem [resolvable:$false] %s2350_s9 }
  0x70   : > { %s2352_s7 = scalar_lea.vmem %s2351_s9, 256  ;;  %p2353_p8 = scmp.lt.s32.totalorder %s423_s0, %s2351_s9 }
  0x71   : > { %p2348_p6 = pnand %p2346_p1, %p3353_p0  ;;  %p2354_p11 = scmp.lt.s32.totalorder %s2352_s7, %s2345_s5 }
  0x73   : > { %p2349_p10 = pneg %p2348_p6  ;;  %p2355_p13 = por %p2354_p11, %p2353_p8 }
  0x75   : > { %p2356_p4 = pnand %p2355_p13, %p2349_p10 }
  0x77   : > { %2359 = shalt.err (!%p2356_p4)
}
  0x78   : > { %2077 = dma.hbm_to_vmem [thread:$0]  (!%p2598_p2), %s1706_s1, 128, %s423_s0, %s2645_s8  }
  0x79   : > { %431 = sbr.rel (%p2582_p12) target bundleno = 813 (0x32d), region = 56  ;;  %s2709_s30 = sand.u32 (!%p2582_p12), 1, %s2437_s10  }
  0x7a   : > { %s2712_s16 = sshll.u32 (!%p2582_p12), %s2709_s30, 6  ;;  %s434_s7 = scalar_lea.sflag (!%p2582_p12), [#allocation4], %s2709_s30 }
  0x7b   : > { %s2716_s20 = scalar_lea.vmem (!%p2582_p12), [#allocation3], %s2712_s16 }
  0x7e   : > { %2412 = dma.done.wait (%p2568_p7), %s434_s7, 1024  }
  0x7f   : > { %2414 = vsyncadd (%p2568_p7), %s434_s7, 4294966272  ;;  %s442_s0 = sand.u32 1, %s2551_s15   ;;  %s2724_s22 = scalar_lea.vmem [#allocation6], %s2712_s16 }
  0x80   : > { %s443_s8 = scalar_lea.sflag [#allocation7], %s442_s0 }
  0x81   : > { %2416 = dma.done.wait (%p2568_p7), %s443_s8, 1152  }
  0x82   : > { %2418 = vsyncadd (%p2568_p7), %s443_s8, 4294966144  ;;  %s1835_s26 = sshll.u32 %s2709_s30, 3  ;;  %p3354_p12 = scmp.eq.s32.totalorder %s2551_s15, 0 }
  0x83   : > { %s2731_s23 = scalar_lea.vmem [#allocation8], %s1835_s26 }
  0x84   : > { %2420 = dma.done.wait (%p3354_p12), [#allocation10], 1280   ;;  %p3355_p2 = pmov %p3354_p12 }
  0x86   : > { %2422 = vsyncadd (%p3355_p2), [#allocation10], 4294966016  ;;  %p3356_p5 = pmov %p3355_p2 }
  0x87   : > { %p3357_p3 = pmov %p3355_p2 }
  0x88   : > { %2424 = dma.done.wait (%p3356_p5), [#allocation13], 1024  }
  0x89   : > { %2426 = vsyncadd (%p3357_p3), [#allocation13], 4294966272  ;;  %v2464_v0 = vmov 0.0   ;;  %s2465_s19 = smov 64   ;;  %v1042_v2 = vlaneseq  ;;  %v2743_v3 = vld [vmem:[#allocation9 + $0x38] sm:$0xff]  ;;  %v2745_v4 = vld [vmem:[#allocation9 + $0x30] sm:$0xff] }
  0x8a   : > { %v1001_v1 = vrot.slane %v2464_v0, 7  ;;  %1935 = vmatprep.subr.mxu0 %v2743_v3  ;;  %1963 = vmatprep.subr.mxu1 %v2743_v3  ;;  %v2753_v6 = vld [vmem:[#allocation9 + $0x28] sm:$0xff]  ;;  %v2759_v7 = vld [vmem:[#allocation9 + $0x20] sm:$0xff]  ;;  %v2766_v9 = vld [vmem:[#allocation9 + $0x18] sm:$0xff]  ;;  %vm542_vm0 = vcmask 523264   ;;  %vm2466_vm1 = vmmov 0  }
  0x8b   : > { %v2749_v5 = vshrl.u32 %v1042_v2, 7  ;;  %1936 = vmatpush3.msra.mxu0 %v2743_v3  ;;  %1964 = vmatpush3.msra.mxu1 %v2743_v3  ;;  %v2768_v10 = vld [vmem:[#allocation11] sm:$0xff]  ;;  %v2774_v11 = vld [vmem:[#allocation9 + $0x10] sm:$0xff]  ;;  %v2781_v13 = vld [vmem:[#allocation9 + $0x8] sm:$0xff]  ;;  %vm1033_vm2 = vcmask 1040384   ;;  %s3358_s29 = sld [smem:[#allocation28_spill]] }
  0x8c   : > { %1009 = vrot.lane.b32.xlu1 %v1001_v1, %s2465_s19  ;;  %1937 = vmatprep.subr.mxu0 %v2745_v4  ;;  %v519_v14 = vld [vmem:[#allocation9] sm:$0xff]  ;;  %v528_v16 = vld [vmem:[%s2716_s20] sm:$0xff]  ;;  %v529_v18 = vld [vmem:[%s2716_s20 + $0x8] sm:$0xff]  ;;  %s3359_s3 = sld [smem:[#allocation30_spill]]  ;;  %s511_s18 = scalar_lea.vmem [#allocation14], %s2712_s16 }
  0x8d   : > { %1965 = vmatprep.subr.mxu1 %v2745_v4  ;;  %1938 = vmatpush3.msra.mxu0 %v2745_v4  ;;  %v1084_v8 = vsub.s32 2, %v2749_v5  ;;  %v1228_v15 = vsub.s32 5, %v2749_v5  ;;  %v712_v17 = vld [vmem:[%s2724_s22] sm:$0xff]  ;;  %v713_v19 = vld [vmem:[%s2724_s22 + $0x8] sm:$0xff]  ;;  %v530_v20 = vld [vmem:[%s2716_s20 + $0x10] sm:$0xff]  ;;  %s3360_s1 = sld [smem:[#allocation21_spill]] }
  0x8e   : > { %1966 = vmatpush3.msra.mxu1 %v2745_v4  ;;  %1939 = vmatprep.subr.mxu0 %v2753_v6  ;;  %v714_v21 = vld [vmem:[%s2724_s22 + $0x10] sm:$0xff]  ;;  %v1858_v22 = vld [vmem:[#allocation11 + $0x8] ss:$0 sm:$0xff]  ;;  %v532_v26 = vld [vmem:[%s2716_s20 + $0x20] sm:$0xff]  ;;  %s3361_s5 = sld [smem:[#allocation22_spill]]  ;;  %s1649_s9 = sshll.u32 %s511_s18, 4  ;;  %s3248_s9 = int_to_ptr.vmem [resolvable:$true] %s1649_s9 }
  0x8f   : > { %1967 = vmatprep.subr.mxu1 %v2753_v6  ;;  %1940 = vmatpush3.msra.mxu0 %v2753_v6  ;;  %v1085_v12 = vrot.slane %v2768_v10, %v1084_v8  ;;  %v1229_v23 = vrot.slane %v2768_v10, %v1228_v15  ;;  %v531_v24 = vld [vmem:[%s2716_s20 + $0x18] sm:$0xff]  ;;  %v716_v27 = vld [vmem:[%s2724_s22 + $0x20] sm:$0xff]  ;;  %v533_v28 = vld [vmem:[%s2716_s20 + $0x28] sm:$0xff]  ;;  %s1634_s8 = scalar_lea.sflag [#allocation5], %s2709_s30  ;;  %s2467_s26 = smov [#allocation14]  }
  0x90   : > { %1968 = vmatpush3.msra.mxu1 %v2753_v6  ;;  %1941 = vmatprep.subr.mxu0 %v2759_v7  ;;  %v715_v25 = vld [vmem:[%s2724_s22 + $0x18] sm:$0xff]  ;;  %v717_v29 = vld [vmem:[%s2724_s22 + $0x28] sm:$0xff]  ;;  %v534_v30 = vld [vmem:[%s2716_s20 + $0x30] sm:$0xff] }
  0x91   : > { %1969 = vmatprep.subr.mxu1 %v2759_v7  ;;  %1942 = vmatpush3.msra.mxu0 %v2759_v7  ;;  %v718_v31 = vld [vmem:[%s2724_s22 + $0x30] sm:$0xff]  ;;  %v535_v32 = vld [vmem:[%s2716_s20 + $0x38] sm:$0xff]  ;;  %v2850_v36 = vld [vmem:[%s3302_s4] ss:$0 sm:$0xff]  ;;  %s3362_s20 = sld [smem:[#allocation31_spill]] }
  0x92   : > { %1970 = vmatpush3.msra.mxu1 %v2759_v7  ;;  %1943 = vmatprep.subr.mxu0 %v2766_v9  ;;  %v719_v33 = vld [vmem:[%s2724_s22 + $0x38] sm:$0xff]  ;;  %s2361_s22 = scalar_lea.vmem %s3248_s9, 1024 }
  0x93   : > { %1971 = vmatprep.subr.mxu1 %v2766_v9  ;;  %1944 = vmatpush3.msra.mxu0 %v2766_v9  ;;  %s1877_s24 = sshll.u32 %s3360_s1, 10  ;;  %p2362_p7 = scmp.ne.s32.totalorder %s3248_s9, %s2361_s22 }
  0x94   : > { %1972 = vmatpush3.msra.mxu1 %v2766_v9  ;;  %1945 = vmatprep.subr.mxu0 %v2774_v11  ;;  %p3363_p9 = scmp.ne.s32.totalorder %s3361_s5, 0 }
  0x95   : > { %1973 = vmatprep.subr.mxu1 %v2774_v11  ;;  %1946 = vmatpush3.msra.mxu0 %v2774_v11 }
  0x96   : > { %1974 = vmatpush3.msra.mxu1 %v2774_v11  ;;  %1087 = vrot.lane.b32.xlu0 %v1085_v12, %s2465_s19  ;;  %p2363_p1 = pnand %p2362_p7, %p3363_p9 }
  0x97   : > { %1947 = vmatprep.subr.mxu0 %v2781_v13  ;;  %1975 = vmatprep.subr.mxu1 %v2781_v13  ;;  %s3246_s0 = scalar_lea.hbm %s3362_s20, %s1877_s24 }
  0x98   : > { %1948 = vmatpush3.msra.mxu0 %v2781_v13  ;;  %1976 = vmatpush3.msra.mxu1 %v2781_v13  ;;  %p2364_p0 = pneg %p2363_p1 }
  0x99   : > { %1949 = vmatprep.subr.mxu0 %v519_v14  ;;  %1977 = vmatprep.subr.mxu1 %v519_v14 }
  0x9a   : > { %1950 = vmatpush3.msra.mxu0 %v519_v14  ;;  %1951 = vmatprep.mubr.msk.f32.mxu0 %vm542_vm0, %v528_v16 }
  0x9b   : > { %1978 = vmatpush3.msra.mxu1 %v519_v14  ;;  %1979 = vmatprep.mubr.msk.f32.mxu1 %vm542_vm0, %v712_v17 }
  0x9c   : > { %1952 = vmatmul.mubr.msk.f32.vlgmr.msra.gmra.mxu0 %vm542_vm0, %v529_v18  ;;  %1980 = vmatmul.mubr.msk.f32.vlgmr.msra.gmra.mxu1 %vm542_vm0, %v713_v19 }
  0x9d   : > { %1954 = vmatprep.mubr.msk.f32.mxu0 %vm542_vm0, %v530_v20  ;;  %1982 = vmatprep.mubr.msk.f32.mxu1 %vm542_vm0, %v714_v21 }
  0x9e   : > { %1375 = vrot.lane.b32.xlu1 %v1858_v22, %s2465_s19  ;;  %1231 = vrot.lane.b32.xlu0 %v1229_v23, %s2465_s19 }
  0x9f   : > { %1991 = vmatprep.subr.mxu0 %v2464_v0 }
  0xa0   : > { %1955 = vmatmul.mubr.msk.f32.gmra.mxu0 %vm542_vm0, %v531_v24  ;;  %1983 = vmatmul.mubr.msk.f32.gmra.mxu1 %vm542_vm0, %v715_v25 }
  0xa1   : > { %1957 = vmatprep.mubr.msk.f32.mxu0 %vm542_vm0, %v532_v26  ;;  %1985 = vmatprep.mubr.msk.f32.mxu1 %vm542_vm0, %v716_v27 }
  0xa2   : > { %1992 = vmatpush3.msra.mxu0 %v2743_v3 }
  0xa3   : > { %1993 = vmatprep.subr.mxu0 %v2464_v0 }
  0xa4   : > { %1958 = vmatmul.mubr.msk.f32.gmra.mxu0 %vm542_vm0, %v533_v28  ;;  %1986 = vmatmul.mubr.msk.f32.gmra.mxu1 %vm542_vm0, %v717_v29 }
  0xa5   : > { %1960 = vmatprep.mubr.msk.f32.mxu0 %vm542_vm0, %v534_v30  ;;  %1988 = vmatprep.mubr.msk.f32.mxu1 %vm542_vm0, %v718_v31 }
  0xa6   : > { %1994 = vmatpush3.msra.mxu0 %v2745_v4 }
  0xa7   : > { %1995 = vmatprep.subr.mxu0 %v2464_v0 }
  0xa8   : > { %1961 = vmatmul.mubr.msk.f32.gmra.mxu0 %vm542_vm0, %v535_v32  ;;  %1989 = vmatmul.mubr.msk.f32.gmra.mxu1 %vm542_vm0, %v719_v33 }
  0xa9   : > { %1996 = vmatpush3.msra.mxu0 %v2753_v6  ;;  %2007 = vmatprep.mubr.msk.f32.mxu0 %vm2466_vm1, %v2464_v0 }
  0xaa   : > { %1997 = vmatprep.subr.mxu0 %v2464_v0 }
  0xab   : > { %1998 = vmatpush3.msra.mxu0 %v2759_v7 }
  0xac   : > { %1999 = vmatprep.subr.mxu0 %v2464_v0 }
  0xad   : > { %2000 = vmatpush3.msra.mxu0 %v2766_v9 }
  0xae   : > { %2001 = vmatprep.subr.mxu0 %v2464_v0 }
  0xaf   : > { %2002 = vmatpush3.msra.mxu0 %v2774_v11 }
  0xb0   : > { %2003 = vmatprep.subr.mxu0 %v2464_v0 }
  0xb1   : > { %2004 = vmatpush3.msra.mxu0 %v2781_v13 }
  0xb2   : > { %2005 = vmatprep.subr.mxu0 %v2464_v0 }
  0xb3   : > { %2006 = vmatpush3.msra.mxu0 %v519_v14 }
  0xfe   : > { %v2904_v31 = vpop.permute.xlu1 %1009 }
 0x108   : > { %v2843_v34 = vpop.permute.xlu0 %1087 }
 0x109   : > { %v1090_v35 = vmul.f32 0.0, %v2843_v34 }
 0x10b   : > { %1106 = vrot.lane.b32.xlu0 %v1090_v35, %s2465_s19 }
 0x110   : > { %v2894_v27 = vpop.permute.xlu0 %1231 }
 0x15c   : > { %v1953_v37 = vpop.f32.mrf.mxu0  ;;  %v1981_v39 = vpop.f32.mrf.mxu1 }
 0x15d   : > { %v639_v38 = vadd.f32 %v1953_v37, %v2850_v36  ;;  %v816_v40 = vadd.f32 %v1981_v39, %v2850_v36 }
 0x15e   : > { %v633_v41 = vpop.f32.mrf.mxu0  ;;  %v810_v43 = vpop.f32.mrf.mxu1 }
 0x15f   : > { %v681_v42 = vmul.f32 0.70710677, %v639_v38  ;;  %v858_v44 = vmul.f32 0.70710677, %v816_v40  ;;  %v2855_v45 = vadd.f32 %v2850_v36, %v633_v41  ;;  %v811_v46 = vadd.f32 %v2850_v36, %v810_v43 }
 0x160   : > { %v1956_v47 = vpop.f32.mrf.mxu0  ;;  %v1984_v48 = vpop.f32.mrf.mxu1  ;;  %v850_v16 = vmul.f32 0.5, %v816_v40  ;;  %v673_v19 = vmul.f32 0.5, %v639_v38 }
 0x161   : > { %2149 = verf.f32 %v681_v42  ;;  %v857_v49 = vmul.f32 0.70710677, %v811_v46  ;;  %v680_v52 = vmul.f32 0.70710677, %v2855_v45  ;;  %v2866_v57 = vadd.f32 %v1984_v48, %v2850_v36 }
 0x162   : > { %2151 = verf.f32 %v858_v44  ;;  %v643_v50 = vpop.f32.mrf.mxu0  ;;  %v820_v51 = vpop.f32.mrf.mxu1  ;;  %v2882_v11 = vadd.f32 %v1956_v47, %v2850_v36  ;;  %v849_v28 = vmul.f32 0.5, %v811_v46  ;;  %v672_v39 = vmul.f32 0.5, %v2855_v45 }
 0x163   : > { %2153 = verf.f32 %v857_v49  ;;  %v860_v4 = vmul.f32 0.70710677, %v2866_v57  ;;  %v2897_v29 = vadd.f32 %v2850_v36, %v643_v50  ;;  %v2902_v30 = vadd.f32 %v2850_v36, %v820_v51  ;;  %v2919_v51 = vpop.permute.xlu1 %1375 }
 0x164   : > { %v2859_v53 = vpop.f32.mrf.mxu0  ;;  %v1987_v54 = vpop.f32.mrf.mxu1  ;;  %2155 = verf.f32 %v680_v52  ;;  %v683_v21 = vmul.f32 0.70710677, %v2882_v11 }
 0x165   : > { %v2869_v59 = vadd.f32 %v1987_v54, %v2850_v36  ;;  %v682_v40 = vmul.f32 0.70710677, %v2897_v29  ;;  %v859_v47 = vmul.f32 0.70710677, %v2902_v30 }
 0x166   : > { %v2861_v55 = vpop.f32.mrf.mxu0  ;;  %v2863_v56 = vpop.f32.mrf.mxu1 }
 0x167   : > { %v862_v7 = vmul.f32 0.70710677, %v2869_v59 }
 0x168   : > { %v1962_v58 = vpop.f32.mrf.mxu0  ;;  %v1990_v61 = vpop.f32.mrf.mxu1 }
 0x169   : > { %v669_v60 = vadd.f32 %v1962_v58, %v2850_v36  ;;  %v2873_v1 = vadd.f32 %v1990_v61, %v2850_v36  ;;  %v852_v58 = vmul.f32 0.5, %v2866_v57 }
 0x16a   : > { %v663_v62 = vpop.f32.mrf.mxu0  ;;  %v840_v3 = vpop.f32.mrf.mxu1 }
 0x16b   : > { %v687_v63 = vmul.f32 0.70710677, %v669_v60  ;;  %v664_v2 = vadd.f32 %v2850_v36, %v663_v62  ;;  %v2878_v6 = vadd.f32 %v2850_v36, %v840_v3  ;;  %v864_v14 = vmul.f32 0.70710677, %v2873_v1 }
 0x16c   : > { %v679_v41 = vmul.f32 0.5, %v669_v60  ;;  %v1208_v3 = vsub.s32 4, %v2749_v5 }
 0x16d   : > { %2157 = verf.f32 %v687_v63  ;;  %v686_v8 = vmul.f32 0.70710677, %v664_v2  ;;  %v863_v12 = vmul.f32 0.70710677, %v2878_v6  ;;  %v678_v43 = vmul.f32 0.5, %v664_v2 }
 0x16e   : > { %v2150_v9 = vpop.eup %2149  ;;  %v855_v57 = vmul.f32 0.5, %v2878_v6 }
 0x16f   : > { %v2152_v13 = vpop.eup %2151  ;;  %2159 = verf.f32 %v686_v8  ;;  %v697_v15 = vadd.f32 1.0, %v2150_v9  ;;  %v1064_v8 = vsub.s32 1, %v2749_v5  ;;  %v1352_v9 = vsub.s32 7, %v2749_v5 }
 0x170   : > { %v874_v17 = vadd.f32 1.0, %v2152_v13  ;;  %2161 = verf.f32 %v860_v4  ;;  %v2154_v18 = vpop.eup %2153  ;;  %v854_v4 = vmul.f32 0.5, %v2869_v59 }
 0x171   : > { %2163 = verf.f32 %v862_v7  ;;  %v2889_v22 = vmul.f32 %v697_v15, %v673_v19  ;;  %v873_v23 = vadd.f32 1.0, %v2154_v18  ;;  %v2156_v26 = vpop.eup %2155  ;;  %v856_v15 = vmul.f32 0.5, %v2873_v1 }
 0x172   : > { %v2886_v20 = vmul.f32 %v874_v17, %v850_v16  ;;  %2165 = verf.f32 %v863_v12  ;;  %v696_v32 = vadd.f32 1.0, %v2156_v26  ;;  %v2952_v18 = vrot.slane %v2768_v10, %v1208_v3 }
 0x173   : > { %2167 = verf.f32 %v864_v14  ;;  %v2906_v33 = vmul.f32 %v873_v23, %v849_v28  ;;  %v1235_v35 = vmul.f32 %v2894_v27, %v2889_v22  ;;  %v1147_v37 = vrot.slane %v2889_v22, 7 }
 0x174   : > { %v1092_v24 = vmul.f32 %v2843_v34, %v2886_v20  ;;  %v1003_v25 = vrot.slane %v2886_v20, 7  ;;  %2169 = verf.f32 %v683_v21  ;;  %v2915_v46 = vmul.f32 %v696_v32, %v672_v39 }
 0x175   : > { %v1002_v48 = vrot.slane %v2906_v33, 7  ;;  %2171 = verf.f32 %v682_v40  ;;  %v1379_v63 = vmul.f32 %v2919_v51, %v2886_v20  ;;  %v1091_v6 = vmul.f32 %v2843_v34, %v2906_v33 }
 0x176   : > { %1110 = vrot.lane.b32.xlu0 %v1092_v24, %s2465_s19  ;;  %1013 = vrot.lane.b32.xlu1 %v1003_v25, %s2465_s19  ;;  %2173 = verf.f32 %v859_v47  ;;  %v1146_v2 = vrot.slane %v2915_v46, 7  ;;  %v2957_v21 = vrot.slane %v2768_v10, %v1064_v8  ;;  %v675_v1 = vmul.f32 0.5, %v2882_v11 }
 0x177   : > { %v2961_v24 = vrot.slane %v2768_v10, %v1352_v9  ;;  %v659_v26 = vadd.f32 %v2859_v53, %v2850_v36  ;;  %v1234_v32 = vmul.f32 %v2894_v27, %v2915_v46 }
 0x178   : > { %v1066_v0 = vmul.f32 0.0, %v2957_v21 }
 0x17a   : > { %v2158_v38 = vpop.eup %2157  ;;  %1252 = vrot.lane.b32.xlu0 %v1235_v35, %s2465_s19  ;;  %1156 = vrot.lane.b32.xlu1 %v1147_v37, %s2465_s19 }
 0x17b   : > { %v703_v42 = vadd.f32 1.0, %v2158_v38 }
 0x17c   : > { %v2160_v44 = vpop.eup %2159 }
 0x17d   : > { %v2162_v49 = vpop.eup %2161  ;;  %v702_v50 = vadd.f32 1.0, %v2160_v44  ;;  %v2921_v52 = vmul.f32 %v703_v42, %v679_v41  ;;  %v831_v44 = vadd.f32 %v2850_v36, %v2863_v56 }
 0x17e   : > { %v2164_v45 = vpop.eup %2163  ;;  %1011 = vrot.lane.b32.xlu0 %v1002_v48, %s2465_s19  ;;  %1300 = vrot.lane.b32.xlu1 %v1003_v25, %s2465_s19  ;;  %v876_v62 = vadd.f32 1.0, %v2162_v49 }
 0x17f   : > { %v2166_v54 = vpop.eup %2165  ;;  %v2926_v60 = vmul.f32 %v702_v50, %v678_v43  ;;  %v878_v7 = vadd.f32 1.0, %v2164_v45  ;;  %v2940_v13 = vmul.f32 %v2894_v27, %v2921_v52  ;;  %v2984_v38 = vmul.f32 %v2952_v18, %v2921_v52 }
 0x180   : > { %v2168_v61 = vpop.eup %2167  ;;  %v879_v12 = vadd.f32 1.0, %v2166_v54  ;;  %v2947_v17 = vmul.f32 %v876_v62, %v852_v58  ;;  %v685_v43 = vmul.f32 0.70710677, %v659_v26  ;;  %v674_v50 = vmul.f32 0.5, %v2897_v29 }
 0x181   : > { %v2170_v14 = vpop.eup %2169  ;;  %v880_v59 = vadd.f32 1.0, %v2168_v61  ;;  %v2945_v16 = vmul.f32 %v2894_v27, %v2926_v60  ;;  %v2954_v19 = vmul.f32 %v878_v7, %v854_v4  ;;  %v2988_v53 = vmul.f32 %v2952_v18, %v2926_v60 }
 0x182   : > { %1396 = vrot.lane.b32.xlu1 %v1379_v63, %s2465_s19  ;;  %1154 = vrot.lane.b32.xlu0 %v1146_v2, %s2465_s19  ;;  %v699_v23 = vadd.f32 1.0, %v2170_v14  ;;  %v2963_v25 = vmul.f32 %v879_v12, %v855_v57  ;;  %v1005_v35 = vrot.slane %v2947_v17, 7  ;;  %v2172_v42 = vpop.eup %2171  ;;  %2175 = verf.f32 %v685_v43  ;;  %v1486_v12 = vld [vmem:[#allocation12 + $0x28] sm:$0xff] }
 0x183   : > { %v2969_v28 = vmul.f32 %v880_v59, %v856_v15  ;;  %v2975_v11 = vmul.f32 %v2957_v21, %v2954_v19  ;;  %v2174_v49 = vpop.eup %2173  ;;  %v698_v45 = vadd.f32 1.0, %v2172_v42  ;;  %v861_v58 = vmul.f32 0.70710677, %v831_v44 }
 0x184   : > { %v2980_v37 = vmul.f32 %v2957_v21, %v2963_v25  ;;  %v2992_v39 = vmul.f32 %v2961_v24, %v2963_v25  ;;  %v2998_v41 = vmul.f32 %v699_v23, %v675_v1  ;;  %v875_v54 = vadd.f32 1.0, %v2174_v49  ;;  %v1484_v23 = vld [vmem:[#allocation12 + $0x18] sm:$0xff] }
 0x185   : > { %v2996_v40 = vmul.f32 %v2961_v24, %v2969_v28  ;;  %v1094_v61 = vmul.f32 %v2843_v34, %v2947_v17  ;;  %v3012_v56 = vmul.f32 %v698_v45, %v674_v50  ;;  %v851_v62 = vmul.f32 0.5, %v2902_v30  ;;  %v1482_v45 = vld [vmem:[#allocation12 + $0x8] sm:$0xff] }
 0x186   : > { %1298 = vrot.lane.b32.xlu1 %v1002_v48, %s2465_s19  ;;  %1108 = vrot.lane.b32.xlu0 %v1091_v6, %s2465_s19  ;;  %v1149_v47 = vrot.slane %v2998_v41, 7  ;;  %v1378_v48 = vmul.f32 %v2919_v51, %v2906_v33  ;;  %v654_v29 = vadd.f32 %v2850_v36, %v2861_v55  ;;  %2177 = verf.f32 %v861_v58  ;;  %v1488_v36 = vld [vmem:[#allocation12 + $0x38] sm:$0xff]  ;;  %v1487_v55 = vld [vmem:[#allocation12 + $0x30] sm:$0xff]  ;;  %v1485_v6 = vld [vmem:[#allocation12 + $0x20] sm:$0xff] }
 0x187   : > { %v3019_v63 = vmul.f32 %v875_v54, %v851_v62  ;;  %v1237_v2 = vmul.f32 %v2894_v27, %v2998_v41  ;;  %v1148_v3 = vrot.slane %v3012_v56, 7  ;;  %v1381_v4 = vmul.f32 %v2919_v51, %v2947_v17  ;;  %2010 = vmatprep.subr.mxu1 %v1488_v36  ;;  %v1481_v54 = vld [vmem:[#allocation12] sm:$0xff] }
 0x188   : > { %v684_v30 = vmul.f32 0.70710677, %v654_v29  ;;  %v1236_v9 = vmul.f32 %v2894_v27, %v3012_v56  ;;  %2011 = vmatpush3.msra.mxu1 %v1488_v36  ;;  %v677_v14 = vmul.f32 0.5, %v659_v26  ;;  %v1007_v59 = vrot.slane %v2954_v19, 7 }
 0x189   : > { %v1093_v7 = vmul.f32 %v2843_v34, %v3019_v63  ;;  %v1004_v8 = vrot.slane %v3019_v63, 7  ;;  %2012 = vmatprep.subr.mxu1 %v1487_v55  ;;  %v1380_v26 = vmul.f32 %v2919_v51, %v3019_v63  ;;  %v1096_v43 = vmul.f32 %v2843_v34, %v2954_v19 }
 0x18a   : > { %1017 = vrot.lane.b32.xlu1 %v1005_v35, %s2465_s19  ;;  %1250 = vrot.lane.b32.xlu0 %v1234_v32, %s2465_s19  ;;  %2179 = verf.f32 %v684_v30  ;;  %v853_v32 = vmul.f32 0.5, %v831_v44  ;;  %v676_v58 = vmul.f32 0.5, %v654_v29  ;;  %v1008_v36 = vrot.slane %v2963_v25, 7 }
 0x18b   : > { %2013 = vmatpush3.msra.mxu1 %v1487_v55  ;;  %v1385_v55 = vmul.f32 %v2919_v51, %v2969_v28 }
 0x18c   : > { %2014 = vmatprep.subr.mxu1 %v1486_v12 }
 0x18d   : > { %2015 = vmatpush3.msra.mxu1 %v1486_v12 }
 0x18e   : > { %1160 = vrot.lane.b32.xlu1 %v1149_v47, %s2465_s19  ;;  %1394 = vrot.lane.b32.xlu0 %v1378_v48, %s2465_s19  ;;  %v1483_v47 = vld [vmem:[#allocation12 + $0x10] sm:$0xff] }
 0x18f   : > { %v2176_v57 = vpop.eup %2175  ;;  %2016 = vmatprep.subr.mxu1 %v1485_v6 }
 0x190   : > { %v701_v15 = vadd.f32 1.0, %v2176_v57  ;;  %2017 = vmatpush3.msra.mxu1 %v1485_v6 }
 0x191   : > { %2018 = vmatprep.subr.mxu1 %v1484_v23 }
 0x192   : > { %1304 = vrot.lane.b32.xlu1 %v1005_v35, %s2465_s19  ;;  %1114 = vrot.lane.b32.xlu0 %v1094_v61, %s2465_s19  ;;  %v3040_v35 = vmul.f32 %v701_v15, %v677_v14 }
 0x193   : > { %v2178_v1 = vpop.eup %2177  ;;  %2019 = vmatpush3.msra.mxu1 %v1484_v23 }
 0x194   : > { %v877_v42 = vadd.f32 1.0, %v2178_v1  ;;  %v1151_v44 = vrot.slane %v3040_v35, 7  ;;  %v1239_v49 = vmul.f32 %v2894_v27, %v3040_v35  ;;  %2020 = vmatprep.subr.mxu1 %v1483_v47 }
 0x195   : > { %2021 = vmatpush3.msra.mxu1 %v1483_v47 }
 0x196   : > { %1256 = vrot.lane.b32.xlu1 %v1237_v2, %s2465_s19  ;;  %1158 = vrot.lane.b32.xlu0 %v1148_v3, %s2465_s19  ;;  %v3048_v48 = vmul.f32 %v877_v42, %v853_v32 }
 0x197   : > { %v2180_v50 = vpop.eup %2179  ;;  %2022 = vmatprep.subr.mxu1 %v1482_v45 }
 0x198   : > { %v700_v61 = vadd.f32 1.0, %v2180_v50  ;;  %v1095_v62 = vmul.f32 %v2843_v34, %v3048_v48  ;;  %2023 = vmatpush3.msra.mxu1 %v1482_v45  ;;  %v1006_v3 = vrot.slane %v3048_v48, 7 }
 0x199   : > { %2024 = vmatprep.subr.mxu1 %v1481_v54 }
 0x19a   : > { %1400 = vrot.lane.b32.xlu1 %v1381_v4, %s2465_s19  ;;  %1112 = vrot.lane.b32.xlu0 %v1093_v7, %s2465_s19  ;;  %v3059_v2 = vmul.f32 %v700_v61, %v676_v58  ;;  %v1153_v4 = vrot.slane %v2921_v52, 7  ;;  %v1152_v7 = vrot.slane %v2926_v60, 7  ;;  %v1297_v52 = vrot.slane %v2969_v28, 7 }
 0x19b   : > { %2025 = vmatpush3.msra.mxu1 %v1481_v54  ;;  %v1382_v60 = vmul.f32 %v2919_v51, %v3048_v48  ;;  %v1332_v54 = vsub.s32 6, %v2749_v5 }
 0x19c   : > { %v1150_v29 = vrot.slane %v3059_v2, 7  ;;  %v1238_v30 = vmul.f32 %v2894_v27, %v3059_v2  ;;  %v1097_v27 = vmul.f32 %v2843_v34, %v2963_v25  ;;  %v1384_v34 = vmul.f32 %v2919_v51, %v2963_v25 }
 0x19e   : > { %1015 = vrot.lane.b32.xlu1 %v1004_v8, %s2465_s19  ;;  %1254 = vrot.lane.b32.xlu0 %v1236_v9, %s2465_s19  ;;  %v1044_v9 = vsub.s32 0, %v2749_v5 }
 0x1a0   : > { %v3104_v12 = vrot.slane %v2768_v10, %v1044_v9 }
 0x1a2   : > { %1302 = vrot.lane.b32.xlu1 %v1004_v8, %s2465_s19  ;;  %1021 = vrot.lane.b32.xlu0 %v1007_v59, %s2465_s19  ;;  %v1107_v8 = vpop.permute.xlu0 %1106 }
 0x1a6   : > { %1398 = vrot.lane.b32.xlu1 %v1380_v26, %s2465_s19  ;;  %1118 = vrot.lane.b32.xlu0 %v1096_v43, %s2465_s19 }
 0x1aa   : > { %1164 = vrot.lane.b32.xlu1 %v1151_v44, %s2465_s19  ;;  %1260 = vrot.lane.b32.xlu0 %v1239_v49, %s2465_s19  ;;  %v1067_v44 = vmul.f32 %v2957_v21, %v2906_v33 }
 0x1ae   : > { %1308 = vrot.lane.b32.xlu1 %v1007_v59, %s2465_s19  ;;  %1116 = vrot.lane.b32.xlu0 %v1095_v62, %s2465_s19  ;;  %v1188_v59 = vsub.s32 3, %v2749_v5 }
 0x1b0   : > { %v3114_v26 = vrot.slane %v2768_v10, %v1188_v59 }
 0x1b2   : > { %1019 = vrot.lane.b32.xlu1 %v1006_v3, %s2465_s19  ;;  %1306 = vrot.lane.b32.xlu0 %v1006_v3, %s2465_s19 }
 0x1b6   : > { %1162 = vrot.lane.b32.xlu1 %v1150_v29, %s2465_s19  ;;  %1258 = vrot.lane.b32.xlu0 %v1238_v30, %s2465_s19  ;;  %v1210_v29 = vmul.f32 %v2952_v18, %v2915_v46 }
 0x1ba   : > { %1168 = vrot.lane.b32.xlu1 %v1153_v4, %s2465_s19  ;;  %1166 = vrot.lane.b32.xlu0 %v1152_v7, %s2465_s19 }
 0x1be   : > { %1023 = vrot.lane.b32.xlu1 %v1008_v36, %s2465_s19  ;;  %1264 = vrot.lane.b32.xlu0 %v2940_v13, %s2465_s19  ;;  %v1383_v13 = vmul.f32 %v2919_v51, %v2954_v19  ;;  %v1034_v51 = vsel %vm1033_vm2, 0.0, %v2904_v31 }
 0x1bf   : > { %v1046_v15 = vmul.f32 %v3104_v12, %v1034_v51 }
 0x1c1   : > { %v1074_v32 = vadd.f32 %v1066_v0, %v1046_v15  ;;  %v1355_v0 = vmul.f32 %v2961_v24, %v2886_v20 }
 0x1c2   : > { %1120 = vrot.lane.b32.xlu1 %v1097_v27, %s2465_s19  ;;  %1310 = vrot.lane.b32.xlu0 %v1008_v36, %s2465_s19  ;;  %v3127_v27 = vrot.slane %v2768_v10, %v1332_v54 }
 0x1c3   : > { %v1130_v49 = vadd.f32 %v1107_v8, %v1074_v32  ;;  %v1354_v8 = vmul.f32 %v2961_v24, %v2906_v33 }
 0x1c6   : > { %1312 = vrot.lane.b32.xlu1 %v1297_v52, %s2465_s19  ;;  %1262 = vrot.lane.b32.xlu0 %v2945_v16, %s2465_s19  ;;  %v889_v16 = vld [vmem:[%s2731_s23] sm:$0xff]  ;;  %v1211_v52 = vmul.f32 %v2952_v18, %v2889_v22  ;;  %s2365_s23 = sshll.u32 %s2467_s26, 4  ;;  %s2366_s23 = int_to_ptr.vmem [resolvable:$false] %s2365_s23 }
 0x1c7   : > { %2008 = vmatmul.mubr.msk.f32.vlgmr.msra.gmra.mxu0 %vm542_vm0, %v889_v16  ;;  %p2368_p6 = scmp.lt.s32.totalorder %s3248_s9, %s2366_s23 }
 0x1ca   : > { %1402 = vrot.lane.b32.xlu1 %v1382_v60, %s2465_s19  ;;  %1404 = vrot.lane.b32.xlu0 %v1383_v13, %s2465_s19 }
 0x1ce   : > { %1406 = vrot.lane.b32.xlu1 %v1384_v34, %s2465_s19  ;;  %1408 = vrot.lane.b32.xlu0 %v1385_v55, %s2465_s19  ;;  %s2367_s19 = scalar_lea.vmem %s2366_s23, 2048 }
 0x1cf   : > { %p2369_p10 = scmp.lt.s32.totalorder %s2367_s19, %s2361_s22 }
 0x1d1   : > { %p2370_p8 = por %p2369_p10, %p2368_p6 }
 0x1d3   : > { %p2371_p11 = pnand %p2370_p8, %p2364_p0 }
 0x1e8   : > { %v3101_v57 = vpop.permute.xlu0 %1110  ;;  %v1014_v25 = vpop.permute.xlu1 %1013 }
 0x1e9   : > { %v1036_v9 = vsel %vm1033_vm2, 0.0, %v1014_v25 }
 0x1ec   : > { %v1253_v28 = vpop.permute.xlu0 %1252  ;;  %v1157_v14 = vpop.permute.xlu1 %1156 }
 0x1ed   : > { %v1179_v50 = vsel %vm1033_vm2, 0.0, %v1157_v14 }
 0x1ee   : > { %v1191_v30 = vmul.f32 %v3114_v26, %v1179_v50 }
 0x1f0   : > { %v1012_v6 = vpop.permute.xlu0 %1011  ;;  %v1301_v1 = vpop.permute.xlu1 %1300 }
 0x1f1   : > { %v1035_v23 = vsel %vm1033_vm2, 0.0, %v1012_v6  ;;  %v1323_v60 = vsel %vm1033_vm2, 0.0, %v1301_v1  ;;  %v1048_v1 = vmul.f32 %v3104_v12, %v1036_v9 }
 0x1f2   : > { %v1047_v42 = vmul.f32 %v3104_v12, %v1035_v23  ;;  %v1335_v10 = vmul.f32 %v3127_v27, %v1323_v60  ;;  %v3145_v23 = vld [vmem:[%s3358_s29] ss:$0 sm:$0xff]  ;;  %v1069_v60 = vmul.f32 %v2957_v21, %v3019_v63 }
 0x1f4   : > { %v1397_v43 = vpop.permute.xlu1 %1396  ;;  %v1155_v31 = vpop.permute.xlu0 %1154  ;;  %v1075_v58 = vadd.f32 %v1067_v44, %v1047_v42 }
 0x1f5   : > { %v1178_v47 = vsel %vm1033_vm2, 0.0, %v1155_v31 }
 0x1f6   : > { %v1190_v45 = vmul.f32 %v3114_v26, %v1178_v47 }
 0x1f8   : > { %v1198_v61 = vadd.f32 %v1190_v45, %v1130_v49  ;;  %v1299_v62 = vpop.permute.xlu1 %1298  ;;  %v1109_v3 = vpop.permute.xlu0 %1108 }
 0x1f9   : > { %v1131_v4 = vadd.f32 %v1109_v3, %v1075_v58  ;;  %v1322_v7 = vsel %vm1033_vm2, 0.0, %v1299_v62 }
 0x1fa   : > { %v1218_v36 = vadd.f32 %v1210_v29, %v1198_v61  ;;  %v1334_v46 = vmul.f32 %v3127_v27, %v1322_v7 }
 0x1fb   : > { %v1199_v5 = vadd.f32 %v1191_v30, %v1131_v4  ;;  %v1212_v30 = vmul.f32 %v2952_v18, %v3012_v56 }
 0x1fc   : > { %v3132_v13 = vpop.permute.xlu1 %1017  ;;  %v1251_v34 = vpop.permute.xlu0 %1250 }
 0x1fd   : > { %v1219_v55 = vadd.f32 %v1211_v52, %v1199_v5  ;;  %v1274_v16 = vadd.f32 %v1251_v34, %v1218_v36 }
 0x1ff   : > { %v1275_v51 = vadd.f32 %v1253_v28, %v1219_v55  ;;  %v1342_v14 = vadd.f32 %v1334_v46, %v1274_v16  ;;  %v1068_v28 = vmul.f32 %v2957_v21, %v2886_v20 }
 0x200   : > { %v1161_v22 = vpop.permute.xlu1 %1160  ;;  %v1395_v15 = vpop.permute.xlu0 %1394 }
 0x201   : > { %v1343_v59 = vadd.f32 %v1335_v10, %v1275_v51  ;;  %v1362_v6 = vadd.f32 %v1354_v8, %v1342_v14  ;;  %v1076_v44 = vadd.f32 %v1068_v28, %v1048_v1  ;;  %v1181_v5 = vsel %vm1033_vm2, 0.0, %v1161_v22 }
 0x202   : > { %v1193_v16 = vmul.f32 %v3114_v26, %v1181_v5  ;;  %v1038_v5 = vsel %vm1033_vm2, 0.0, %v3132_v13 }
 0x203   : > { %v1363_v33 = vadd.f32 %v1355_v0, %v1343_v59  ;;  %v1418_v25 = vadd.f32 %v1395_v15, %v1362_v6  ;;  %v1132_v62 = vadd.f32 %v3101_v57, %v1076_v44  ;;  %v1213_v15 = vmul.f32 %v2952_v18, %v2998_v41 }
 0x204   : > { %v1305_v32 = vpop.permute.xlu1 %1304  ;;  %v3149_v42 = vpop.permute.xlu0 %1114 }
 0x205   : > { %v1419_v31 = vadd.f32 %v1397_v43, %v1363_v33  ;;  %v1433_v47 = vadd.f32 %v3145_v23, %v1418_v25  ;;  %v1356_v25 = vmul.f32 %v2961_v24, %v3019_v63 }
 0x207   : > { %v1434_v49 = vadd.f32 %v3145_v23, %v1419_v31  ;;  %v1449_v50 = vmul.f32 0.70710677, %v1433_v47  ;;  %v1441_v0 = vmul.f32 0.5, %v1433_v47 }
 0x208   : > { %v1257_v45 = vpop.permute.xlu1 %1256  ;;  %v1159_v54 = vpop.permute.xlu0 %1158 }
 0x209   : > { %v1450_v58 = vmul.f32 0.70710677, %v1434_v49  ;;  %2181 = verf.f32 %v1449_v50  ;;  %v1180_v61 = vsel %vm1033_vm2, 0.0, %v1159_v54  ;;  %v1442_v50 = vmul.f32 0.5, %v1434_v49 }
 0x20a   : > { %v1192_v20 = vmul.f32 %v3114_v26, %v1180_v61 }
 0x20b   : > { %2183 = verf.f32 %v1450_v58  ;;  %v1325_v58 = vsel %vm1033_vm2, 0.0, %v1305_v32 }
 0x20c   : > { %v1200_v3 = vadd.f32 %v1192_v20, %v1132_v62  ;;  %v1401_v29 = vpop.permute.xlu1 %1400  ;;  %v1113_v43 = vpop.permute.xlu0 %1112  ;;  %v1337_v47 = vmul.f32 %v3127_v27, %v1325_v58 }
 0x20e   : > { %v1220_v4 = vadd.f32 %v1212_v30, %v1200_v3 }
 0x210   : > { %v1016_v7 = vpop.permute.xlu1 %1015  ;;  %v1255_v36 = vpop.permute.xlu0 %1254 }
 0x211   : > { %v1037_v52 = vsel %vm1033_vm2, 0.0, %v1016_v7  ;;  %v1276_v51 = vadd.f32 %v1255_v36, %v1220_v4 }
 0x212   : > { %v1049_v57 = vmul.f32 %v3104_v12, %v1037_v52 }
 0x214   : > { %v1077_v34 = vadd.f32 %v1069_v60, %v1049_v57  ;;  %v1303_v46 = vpop.permute.xlu1 %1302  ;;  %v1022_v55 = vpop.permute.xlu0 %1021  ;;  %v1050_v60 = vmul.f32 %v3104_v12, %v1038_v5 }
 0x215   : > { %v1324_v8 = vsel %vm1033_vm2, 0.0, %v1303_v46  ;;  %v1040_v56 = vsel %vm1033_vm2, 0.0, %v1022_v55 }
 0x216   : > { %v2182_v9 = vpop.eup %2181  ;;  %v1133_v10 = vadd.f32 %v1113_v43, %v1077_v34  ;;  %v1336_v14 = vmul.f32 %v3127_v27, %v1324_v8  ;;  %v1052_v22 = vmul.f32 %v3104_v12, %v1040_v56  ;;  %v1071_v8 = vmul.f32 %v2957_v21, %v3048_v48 }
 0x217   : > { %v1465_v59 = vadd.f32 1.0, %v2182_v9 }
 0x218   : > { %v2184_v6 = vpop.eup %2183  ;;  %v1201_v1 = vadd.f32 %v1193_v16, %v1133_v10  ;;  %v1344_v33 = vadd.f32 %v1336_v14, %v1276_v51  ;;  %v1399_v28 = vpop.permute.xlu1 %1398  ;;  %v1080_v31 = vadd.f32 %v2975_v11, %v1052_v22  ;;  %v1357_v11 = vmul.f32 %v2961_v24, %v2947_v17 }
 0x219   : > { %v1119_v44 = vpop.permute.xlu0 %1118  ;;  %v1473_v54 = vmul.f32 %v1465_v59, %v1441_v0  ;;  %v1466_v61 = vadd.f32 1.0, %v2184_v6  ;;  %v1070_v16 = vmul.f32 %v2957_v21, %v2947_v17  ;;  %v1215_v21 = vmul.f32 %v2952_v18, %v3040_v35 }
 0x21a   : > { %v1221_v62 = vadd.f32 %v1213_v15, %v1201_v1  ;;  %v1364_v20 = vadd.f32 %v1356_v25, %v1344_v33  ;;  %v1214_v25 = vmul.f32 %v2952_v18, %v3059_v2 }
 0x21b   : > { %2026 = vmatprep.mubr.msk.f32.mxu1 %vm542_vm0, %v1473_v54  ;;  %v1474_v41 = vmul.f32 %v1466_v61, %v1442_v50  ;;  %v1136_v54 = vadd.f32 %v1119_v44, %v1080_v31 }
 0x21c   : > { %v1277_v3 = vadd.f32 %v1257_v45, %v1221_v62  ;;  %v1420_v43 = vadd.f32 %v1399_v28, %v1364_v20  ;;  %v1165_v30 = vpop.permute.xlu1 %1164 }
 0x21d   : > { %v1261_v63 = vpop.permute.xlu0 %1260  ;;  %2027 = vmatmul.mubr.msk.f32.vlgmr.msra.gmra.mxu1 %vm542_vm0, %v1474_v41  ;;  %v1183_v13 = vsel %vm1033_vm2, 0.0, %v1165_v30 }
 0x21e   : > { %v1345_v49 = vadd.f32 %v1337_v47, %v1277_v3  ;;  %v1435_v32 = vadd.f32 %v3145_v23, %v1420_v43  ;;  %v1195_v0 = vmul.f32 %v3114_v26, %v1183_v13 }
 0x220   : > { %v1451_v4 = vmul.f32 0.70710677, %v1435_v32  ;;  %v1309_v7 = vpop.permute.xlu1 %1308  ;;  %v1365_v52 = vadd.f32 %v1357_v11, %v1345_v49  ;;  %v1443_v35 = vmul.f32 0.5, %v1435_v32  ;;  %v1358_v49 = vmul.f32 %v2961_v24, %v3048_v48 }
 0x221   : > { %v1117_v36 = vpop.permute.xlu0 %1116  ;;  %v1327_v58 = vsel %vm1033_vm2, 0.0, %v1309_v7 }
 0x222   : > { %2185 = verf.f32 %v1451_v4  ;;  %v1421_v45 = vadd.f32 %v1401_v29, %v1365_v52  ;;  %v1078_v29 = vadd.f32 %v1070_v16, %v1050_v60  ;;  %v1339_v31 = vmul.f32 %v3127_v27, %v1327_v58 }
 0x224   : > { %v1020_v57 = vpop.permute.xlu1 %1019  ;;  %v1436_v46 = vadd.f32 %v3145_v23, %v1421_v45  ;;  %v1134_v15 = vadd.f32 %v3149_v42, %v1078_v29  ;;  %v1359_v45 = vmul.f32 %v2961_v24, %v2954_v19 }
 0x225   : > { %v1307_v34 = vpop.permute.xlu0 %1306  ;;  %v1039_v55 = vsel %vm1033_vm2, 0.0, %v1020_v57 }
 0x226   : > { %v1051_v56 = vmul.f32 %v3104_v12, %v1039_v55  ;;  %v1452_v9 = vmul.f32 0.70710677, %v1436_v46  ;;  %v1326_v1 = vsel %vm1033_vm2, 0.0, %v1307_v34  ;;  %v1444_v55 = vmul.f32 0.5, %v1436_v46 }
 0x227   : > { %v1338_v47 = vmul.f32 %v3127_v27, %v1326_v1 }
 0x228   : > { %v1079_v10 = vadd.f32 %v1071_v8, %v1051_v56  ;;  %v1163_v51 = vpop.permute.xlu1 %1162  ;;  %2187 = verf.f32 %v1452_v9 }
 0x229   : > { %v1259_v14 = vpop.permute.xlu0 %1258  ;;  %v1182_v22 = vsel %vm1033_vm2, 0.0, %v1163_v51 }
 0x22a   : > { %v1135_v17 = vadd.f32 %v1117_v36, %v1079_v10  ;;  %v1194_v59 = vmul.f32 %v3114_v26, %v1182_v22 }
 0x22c   : > { %v1203_v6 = vadd.f32 %v1195_v0, %v1135_v17  ;;  %v1202_v33 = vadd.f32 %v1194_v59, %v1134_v15  ;;  %v1169_v28 = vpop.permute.xlu1 %1168 }
 0x22d   : > { %v1167_v50 = vpop.permute.xlu0 %1166  ;;  %v1185_v52 = vsel %vm1033_vm2, 0.0, %v1169_v28 }
 0x22e   : > { %v1184_v42 = vsel %vm1033_vm2, 0.0, %v1167_v50  ;;  %v1222_v61 = vadd.f32 %v1214_v25, %v1202_v33  ;;  %v1223_v20 = vadd.f32 %v1215_v21, %v1203_v6 }
 0x22f   : > { %v1196_v62 = vmul.f32 %v3114_v26, %v1184_v42  ;;  %v2186_v41 = vpop.eup %2185 }
 0x230   : > { %v1467_v3 = vadd.f32 1.0, %v2186_v41  ;;  %v1278_v43 = vadd.f32 %v1259_v14, %v1222_v61  ;;  %v1024_v11 = vpop.permute.xlu1 %1023  ;;  %v1279_v2 = vadd.f32 %v1261_v63, %v1223_v20 }
 0x231   : > { %v1204_v30 = vadd.f32 %v1196_v62, %v1136_v54  ;;  %v1265_v18 = vpop.permute.xlu0 %1264  ;;  %v1041_v44 = vsel %vm1033_vm2, 0.0, %v1024_v11 }
 0x232   : > { %v1475_v4 = vmul.f32 %v1467_v3, %v1443_v35  ;;  %v1346_v7 = vadd.f32 %v1338_v47, %v1278_v43  ;;  %v1053_v36 = vmul.f32 %v3104_v12, %v1041_v44  ;;  %v1347_v5 = vadd.f32 %v1339_v31, %v1279_v2 }
 0x233   : > { %v1224_v32 = vadd.f32 %v2988_v53, %v1204_v30  ;;  %v1197_v12 = vmul.f32 %v3114_v26, %v1185_v52 }
 0x234   : > { %v1081_v63 = vadd.f32 %v2980_v37, %v1053_v36  ;;  %v1121_v60 = vpop.permute.xlu1 %1120  ;;  %2029 = vmatprep.mubr.msk.f32.mxu1 %vm542_vm0, %v1475_v4  ;;  %v1366_v34 = vadd.f32 %v1358_v49, %v1346_v7  ;;  %v1367_v16 = vadd.f32 %v1359_v45, %v1347_v5  ;;  %v1860_v36 = vld [vmem:[%s3359_s3] ss:$0 sm:$0xff] }
 0x235   : > { %v1311_v57 = vpop.permute.xlu0 %1310  ;;  %v2188_v48 = vpop.eup %2187 }
 0x236   : > { %v1137_v8 = vadd.f32 %v1121_v60, %v1081_v63  ;;  %v1328_v53 = vsel %vm1033_vm2, 0.0, %v1311_v57  ;;  %v1468_v56 = vadd.f32 1.0, %v2188_v48 }
 0x237   : > { %v1340_v24 = vmul.f32 %v3127_v27, %v1328_v53 }
 0x238   : > { %v1205_v9 = vadd.f32 %v1197_v12, %v1137_v8  ;;  %v1313_v13 = vpop.permute.xlu1 %1312  ;;  %v1476_v19 = vmul.f32 %v1468_v56, %v1444_v55 }
 0x239   : > { %v1263_v29 = vpop.permute.xlu0 %1262  ;;  %v1329_v37 = vsel %vm1033_vm2, 0.0, %v1313_v13 }
 0x23a   : > { %v1280_v10 = vadd.f32 %v1263_v29, %v1224_v32  ;;  %v1225_v51 = vadd.f32 %v2984_v38, %v1205_v9  ;;  %2030 = vmatmul.mubr.msk.f32.gmra.mxu1 %vm542_vm0, %v1476_v19  ;;  %v1341_v26 = vmul.f32 %v3127_v27, %v1329_v37 }
 0x23c   : > { %v1348_v46 = vadd.f32 %v1340_v24, %v1280_v10  ;;  %v1281_v14 = vadd.f32 %v1265_v18, %v1225_v51  ;;  %v1403_v22 = vpop.permute.xlu1 %1402 }
 0x23d   : > { %v1405_v15 = vpop.permute.xlu0 %1404  ;;  %v1422_v0 = vadd.f32 %v1403_v22, %v1366_v34 }
 0x23e   : > { %v1423_v17 = vadd.f32 %v1405_v15, %v1367_v16  ;;  %v1368_v59 = vadd.f32 %v2992_v39, %v1348_v46  ;;  %v1349_v21 = vadd.f32 %v1341_v26, %v1281_v14 }
 0x23f   : > { %v1437_v6 = vadd.f32 %v3145_v23, %v1422_v0 }
 0x240   : > { %v1438_v1 = vadd.f32 %v3145_v23, %v1423_v17  ;;  %v1407_v33 = vpop.permute.xlu1 %1406  ;;  %v1369_v38 = vadd.f32 %v2996_v40, %v1349_v21 }
 0x241   : > { %v1409_v25 = vpop.permute.xlu0 %1408  ;;  %v1453_v28 = vmul.f32 0.70710677, %v1437_v6  ;;  %v1424_v54 = vadd.f32 %v1407_v33, %v1368_v59  ;;  %v1445_v41 = vmul.f32 0.5, %v1437_v6 }
 0x242   : > { %v1454_v50 = vmul.f32 0.70710677, %v1438_v1  ;;  %v1425_v42 = vadd.f32 %v1409_v25, %v1369_v38  ;;  %v1446_v40 = vmul.f32 0.5, %v1438_v1 }
 0x243   : > { %2189 = verf.f32 %v1453_v28  ;;  %v1439_v27 = vadd.f32 %v3145_v23, %v1424_v54 }
 0x244   : > { %2191 = verf.f32 %v1454_v50  ;;  %v1440_v58 = vadd.f32 %v3145_v23, %v1425_v42 }
 0x245   : > { %v1455_v39 = vmul.f32 0.70710677, %v1439_v27  ;;  %v1447_v18 = vmul.f32 0.5, %v1439_v27 }
 0x246   : > { %v1456_v61 = vmul.f32 0.70710677, %v1440_v58  ;;  %v1448_v23 = vmul.f32 0.5, %v1440_v58 }
 0x247   : > { %2193 = verf.f32 %v1455_v39 }
 0x248   : > { %2195 = verf.f32 %v1456_v61 }
 0x250   : > { %v2190_v62 = vpop.eup %2189 }
 0x251   : > { %v2192_v20 = vpop.eup %2191  ;;  %v1469_v35 = vadd.f32 1.0, %v2190_v62 }
 0x252   : > { %v1470_v47 = vadd.f32 1.0, %v2192_v20 }
 0x253   : > { %v1477_v3 = vmul.f32 %v1469_v35, %v1445_v41 }
 0x254   : > { %v1478_v43 = vmul.f32 %v1470_v47, %v1446_v40  ;;  %v2194_v30 = vpop.eup %2193 }
 0x255   : > { %2032 = vmatprep.mubr.msk.f32.mxu1 %vm542_vm0, %v1477_v3  ;;  %v2196_v11 = vpop.eup %2195  ;;  %v1471_v2 = vadd.f32 1.0, %v2194_v30 }
 0x256   : > { %2033 = vmatmul.mubr.msk.f32.gmra.mxu1 %vm542_vm0, %v1478_v43  ;;  %v1472_v31 = vadd.f32 1.0, %v2196_v11 }
 0x257   : > { %v1479_v44 = vmul.f32 %v1471_v2, %v1447_v18 }
 0x258   : > { %v1480_v49 = vmul.f32 %v1472_v31, %v1448_v23 }
 0x259   : > { %2035 = vmatprep.mubr.msk.f32.mxu1 %vm542_vm0, %v1479_v44 }
 0x25a   : > { %2036 = vmatmul.mubr.msk.f32.gmra.mxu1 %vm542_vm0, %v1480_v49 }
 0x287   : > { %v959_v4 = vpop.f32.mrf.mxu0 }
 0x289   : > { %v2009_v7 = vpop.f32.mrf.mxu0 }
 0x2dd   : > { %v2028_v32 = vpop.f32.mrf.mxu1 }
 0x2de   : > { %v1592_v52 = vadd.f32 %v2028_v32, %v1860_v36 }
 0x2df   : > { %v1586_v5 = vpop.f32.mrf.mxu1 }
 0x2e0   : > { %1626 = vst.msk [vmem:[%s511_s18 + $0x8] sm:$0xff] %vm542_vm0, %v1592_v52  ;;  %v1587_v45 = vadd.f32 %v1860_v36, %v1586_v5 }
 0x2e2   : > { %1625 = vst.msk [vmem:[%s511_s18] sm:$0xff] %vm542_vm0, %v1587_v45 }
 0x2fa   : > { %v2031_v63 = vpop.f32.mrf.mxu1 }
 0x2fb   : > { %v1602_v60 = vadd.f32 %v2031_v63, %v1860_v36 }
 0x2fc   : > { %v1596_v57 = vpop.f32.mrf.mxu1 }
 0x2fd   : > { %1628 = vst.msk [vmem:[%s511_s18 + $0x18] sm:$0xff] %vm542_vm0, %v1602_v60  ;;  %v1597_v34 = vadd.f32 %v1860_v36, %v1596_v57 }
 0x2ff   : > { %1627 = vst.msk [vmem:[%s511_s18 + $0x10] sm:$0xff] %vm542_vm0, %v1597_v34 }
 0x316   : > { %v2034_v48 = vpop.f32.mrf.mxu1 }
 0x317   : > { %v1612_v55 = vadd.f32 %v2034_v48, %v1860_v36 }
 0x318   : > { %v1606_v16 = vpop.f32.mrf.mxu1 }
 0x319   : > { %1630 = vst.msk [vmem:[%s511_s18 + $0x28] sm:$0xff] %vm542_vm0, %v1612_v55  ;;  %v1607_v12 = vadd.f32 %v1860_v36, %v1606_v16 }
 0x31a   : > { %v2037_v8 = vpop.f32.mrf.mxu1 }
 0x31b   : > { %1629 = vst.msk [vmem:[%s511_s18 + $0x20] sm:$0xff] %vm542_vm0, %v1607_v12  ;;  %v1622_v53 = vadd.f32 %v2037_v8, %v1860_v36 }
 0x31c   : > { %v1616_v56 = vpop.f32.mrf.mxu1 }
 0x31d   : > { %1632 = vst.msk [vmem:[%s511_s18 + $0x38] sm:$0xff] %vm542_vm0, %v1622_v53  ;;  %v1617_v9 = vadd.f32 %v1860_v36, %v1616_v56 }
 0x31f   : > { %1631 = vst.msk [vmem:[%s511_s18 + $0x30] sm:$0xff] %vm542_vm0, %v1617_v9 }
 0x320   : > { %2374 = shalt.err (!%p2371_p11)
}
 0x321   : > { %s2375_s15 = scalar_lea.hbm %s3246_s0, 1024  ;;  %s2379_s25 = scalar_lea.hbm %s3362_s20, 2048 }
 0x322   : > { %p2376_p13 = scmp.ne.s32.totalorder %s3246_s0, %s2375_s15  ;;  %p2380_p2 = scmp.lt.s32.totalorder %s3246_s0, %s3362_s20 }
 0x323   : > { %p2381_p5 = scmp.lt.s32.totalorder %s2379_s25, %s2375_s15 }
 0x324   : > { %p2377_p4 = pnand %p2376_p13, %p3363_p9 }
 0x325   : > { %p2382_p3 = por %p2381_p5, %p2380_p2 }
 0x326   : > { %p2378_p12 = pneg %p2377_p4 }
 0x328   : > { %p2383_p7 = pnand %p2382_p3, %p2378_p12 }
 0x32a   : > { %2386 = shalt.err (!%p2383_p7)
}
 0x32b   : > { %s2468_s28 = smov 128   ;;  %s2469_s3 = smov 8  }
 0x32c   : > { %2056 = dma.vmem_to_hbm [thread:$0]  (%p3363_p9), %s3248_s9, 1024, %s3246_s0, %s1634_s8, %s2468_s28, %s2468_s28, %s2469_s3  }
 0x32d PF: > { %s3364_s1 = sld [smem:[#allocation20_spill]]  ;;  %p3367_p0 = scmp.ge.s32.totalorder %s2453_s14, 2 }
 0x32e   : > { %s3365_s18 = sld [smem:[#allocation23_spill]] }
 0x333   : > { %s1664_s24 = sand.u32 1, %s3364_s1  }
 0x334   : > { %p3366_p1 = scmp.ne.s32.totalorder %s3365_s18, 0  ;;  %s1665_s16 = scalar_lea.sflag [#allocation5], %s1664_s24 }
 0x336   : > { %p2079_p6 = pnand %p3367_p0, %p3366_p1 }
 0x338   : > { %p2080_p10 = pneg %p2079_p6 }
 0x33a   : > { %2428 = dma.done.wait (%p2080_p10), %s1665_s16, 1024  }
 0x33b   : > { %2430 = vsyncadd (%p2080_p10), %s1665_s16, 4294966272  ;;  %s30_s14 = sadd.s32 1, %s2453_s14   ;;  %s3368_s30 = smov %s2437_s10 }
 0x33c   : > { %p27_p8 = scmp.ge.s32.totalorder %s30_s14, 4   ;;  %s3369_s10 = smov %s2441_s11 }
 0x33d   : > { %s3370_s11 = smov %s2637_s17  ;;  %s3371_s12 = smov %s2449_s13 }
 0x33e   : > { %s3372_s13 = smov %s3374_s27  ;;  %29 = sbr.rel (!%p27_p8) target bundleno = 19 (0x13), region = 138 }
 0x343   :  { %1670 = vsyncpa [#allocation4], 1 }
 0x344   :  { %1672 = vsyncpa [#allocation4 + $0x1], 1 }
 0x345   :  { %1673 = vsyncpa [#allocation7], 1 }
 0x346   :  { %1675 = vsyncpa [#allocation7 + $0x1], 1 }
 0x347   :  { %1676 = vsyncpa [#allocation10], 1 }
 0x348   :  { %1677 = vsyncpa [#allocation13], 1 }
 0x349   :  { %1678 = vsyncpa [#allocation5], 1 }
 0x34a   :  { %1680 = vsyncpa [#allocation5 + $0x1], 1 }

</bundles_post_ra>
